<compile_context>
chip_gen: v7x
topology: tpu7x:2x2x1
jax: 0.10.0
libtpu: 0.0.40
codegen_flags: <defaults>
</compile_context>

<pallas_src>
import jax
import jax.numpy as jnp
from jax.experimental import pallas as pl
from jax.experimental.pallas import tpu as pltpu


def encoder_kernel(gx_ref, len_ref, w_ref, out_ref):
    # gx_ref : (T, B, 4H) f32 layer-0 gate pre-activations (emb@Wih0.T + bih0 + bhh0),
    #          gate columns pre-permuted to [i, f, o, g].
    # len_ref: (B, 1) int32 sequence lengths.
    # w_ref  : (Rpad, 8H) f32 consolidated weight slab:
    #          rows [0 ,  H), lanes [0, 8H): W_a  = [Whh0.T | Wih1.T]
    #          rows [H , 2H), lanes [0, 4H): W_b  = Whh1.T
    #          rows [2H, 3H), lanes [0,  Z): Wout0 (acts on c0)
    #          rows [3H, 4H), lanes [0,  Z): Wout1 (acts on c1)
    #          row   4H     , lanes [0, 4H): b1 = bih1 + bhh1
    #          row   4H+1   , lanes [0,  Z): bout
    # out_ref: (B, Z) f32
    T, B, G = gx_ref.shape
    H = G // 4
    Z = out_ref.shape[1]

    # One-time weight loads (single input DMA; static vreg-aligned views).
    w_a = w_ref[0:H, :]                       # (H, 8H)
    w_b = w_ref[H:2 * H, 0:G]                 # (H, 4H)
    w_o0 = w_ref[2 * H:3 * H, 0:Z]            # (H, Z)
    w_o1 = w_ref[3 * H:4 * H, 0:Z]            # (H, Z)
    b1 = w_ref[4 * H:4 * H + 1, 0:G]          # (1, 4H)
    bout = w_ref[4 * H + 1:4 * H + 2, 0:Z]    # (1, Z)

    # Validity masks for every timestep, computed once (off the recurrence chain);
    # each mask is reused by all jnp.where calls that need it.
    len_bh = jnp.broadcast_to(len_ref[...], (B, H))          # single broadcast
    masks = [len_bh > t for t in range(T)]                    # T x (B, H) bool

    def cell(gates, c):
        # gate columns [i | f | o | g]: one full-width sigmoid, one narrow tanh.
        sig = jax.nn.sigmoid(gates)
        g = jnp.tanh(gates[:, 3 * H:])
        i = sig[:, 0:H]
        f = sig[:, H:2 * H]
        o = sig[:, 2 * H:3 * H]
        c_new = f * c + i * g
        h_new = o * jnp.tanh(c_new)
        return h_new, c_new

    zeros_bh = jnp.zeros((B, H), jnp.float32)
    h0, c0 = zeros_bh, zeros_bh
    h1, c1 = zeros_bh, zeros_bh

    # Diagonal 0: layer-0 time 0 only; recurrent term is exactly zero -> no matmul.
    h0n, c0n = cell(gx_ref[0], c0)
    h0 = jnp.where(masks[0], h0n, h0)
    c0 = jnp.where(masks[0], c0n, c0)

    # Wavefront diagonals 1..T-1: layer-0 time d and layer-1 time d-1 share one
    # fused h0 matmul; the h1 matmul is independent so the two pipeline on the MXU.
    # T is small and static -> fully unrolled Python loop (static offsets).
    for d in range(1, T):
        ga = jnp.dot(h0, w_a, preferred_element_type=jnp.float32)   # (B, 8H)
        gb = jnp.dot(h1, w_b, preferred_element_type=jnp.float32)   # (B, 4H)

        # layer 0, time d (prefetched gates + recurrent gates).
        h0n, c0n = cell(gx_ref[d] + ga[:, 0:G], c0)
        # layer 1, time d-1; its input h0(d-1) is already inside ga (dropout p=0).
        h1n, c1n = cell(ga[:, G:] + gb + b1, c1)

        m0, m1 = masks[d], masks[d - 1]
        h0 = jnp.where(m0, h0n, h0)
        c0 = jnp.where(m0, c0n, c0)
        h1 = jnp.where(m1, h1n, h1)
        c1 = jnp.where(m1, c1n, c1)

    # Final diagonal: layer-1 time T-1 only (h outputs no longer needed).
    ga = jnp.dot(h0, w_a[:, G:], preferred_element_type=jnp.float32)  # (B, 4H)
    gb = jnp.dot(h1, w_b, preferred_element_type=jnp.float32)         # (B, 4H)
    _, c1n = cell(ga + gb + b1, c1)
    c1 = jnp.where(masks[T - 1], c1n, c1)

    # Epilogue: c_n.permute(1,2,0).view(B,-1) @ Wlin.T + blin; the (hidden, layer)
    # interleave is folded into w_o0/w_o1 so there is no lane concat.
    out_ref[...] = (jnp.dot(c0, w_o0, preferred_element_type=jnp.float32)
                    + jnp.dot(c1, w_o1, preferred_element_type=jnp.float32)
                    + bout)


def encoder_forward(x_ids, lengths, emb,
                    wih0, whh0, bih0, bhh0,
                    wih1, whh1, bih1, bhh1,
                    wlin, blin):
    B, T = x_ids.shape
    H = whh0.shape[1]
    G = 4 * H
    W2 = 2 * G
    Z = wlin.shape[0]

    # Gate-row permutation: PyTorch [i, f, g, o] -> kernel [i, f, o, g].
    perm = jnp.concatenate([jnp.arange(0, 2 * H),
                            jnp.arange(3 * H, 4 * H),
                            jnp.arange(2 * H, 3 * H)])

    def gperm(w):
        return w[perm]

    # (1) Embedding + layer-0 input projection folded into ONE (V, 4H) table with
    #     biases included; gathered per token -> lane-dense (T, B, 4H) slab.
    b0 = (gperm(bih0) + gperm(bhh0)).reshape(1, G)
    emb_proj = emb.astype(jnp.float32) @ gperm(wih0).T + b0          # (V, 4H)
    gx = jnp.transpose(emb_proj[x_ids], (1, 0, 2)).astype(jnp.float32)  # (T, B, 4H)

    # (2) Consolidated weight slab (single DMA), 256 lanes wide.
    def pad_lanes(a):
        return jnp.pad(a, ((0, 0), (0, W2 - a.shape[1])))

    w_a = jnp.concatenate([gperm(whh0).T, gperm(wih1).T], axis=1)    # (H, 8H)
    w_b = pad_lanes(gperm(whh1).T)                                   # (H, 8H)
    # Flatten order of c_n.permute(1,2,0).view(B,-1) is feature j = h*L + l:
    # even columns of wlin act on layer 0, odd columns on layer 1.
    w_o0 = pad_lanes(wlin[:, 0::2].T)                                # (H, 8H)
    w_o1 = pad_lanes(wlin[:, 1::2].T)                                # (H, 8H)
    b1 = pad_lanes((gperm(bih1) + gperm(bhh1)).reshape(1, G))        # (1, 8H)
    bout = pad_lanes(blin.reshape(1, Z))                             # (1, 8H)
    wslab = jnp.concatenate([w_a, w_b, w_o0, w_o1, b1, bout], axis=0)
    pad_r = (-wslab.shape[0]) % 8
    wslab = jnp.pad(wslab, ((0, pad_r), (0, 0))).astype(jnp.float32)

    len2d = lengths.reshape(B, 1).astype(jnp.int32)

    vmem = pl.BlockSpec(memory_space=pltpu.MemorySpace.VMEM)
    # TODO(synk): for large B, grid over batch tiles (multiple of 8 sublanes) with
    # dimension_semantics=("parallel",), constant index_maps for the weight slab,
    # and block sizes kept under v7x's 64 MiB VMEM.
    return pl.pallas_call(
        encoder_kernel,
        out_shape=jax.ShapeDtypeStruct((B, Z), jnp.float32),
        in_specs=[vmem, vmem, vmem],
        out_specs=vmem,
    )(gx, len2d, wslab)


def encoder_reference(x_ids, lengths, emb,
                      wih0, whh0, bih0, bhh0,
                      wih1, whh1, bih1, bhh1,
                      wlin, blin):
    # Pure-JAX reference with PyTorch gate order [i, f, g, o] and packed-sequence
    # semantics via state freezing.
    B, T = x_ids.shape
    H = whh0.shape[1]
    x = emb[x_ids].astype(jnp.float32)

    def cell(x_t, h, c, wih, whh, bih, bhh):
        g = x_t @ wih.T + bih + h @ whh.T + bhh
        i, f, gg, o = jnp.split(g, 4, axis=1)
        i, f, o = jax.nn.sigmoid(i), jax.nn.sigmoid(f), jax.nn.sigmoid(o)
        gg = jnp.tanh(gg)
        c_new = f * c + i * gg
        return o * jnp.tanh(c_new), c_new

    z = jnp.zeros((B, H), jnp.float32)
    h0, c0, h1, c1 = z, z, z, z
    for t in range(T):
        m = (lengths > t).reshape(B, 1)
        h0n, c0n = cell(x[:, t], h0, c0, wih0, whh0, bih0, bhh0)
        h0 = jnp.where(m, h0n, h0)
        c0 = jnp.where(m, c0n, c0)
        h1n, c1n = cell(h0, h1, c1, wih1, whh1, bih1, bhh1)
        h1 = jnp.where(m, h1n, h1)
        c1 = jnp.where(m, c1n, c1)

    cn = jnp.stack([c0, c1], axis=0)                        # (L, B, H)
    feat = jnp.transpose(cn, (1, 2, 0)).reshape(B, -1)      # permute(1,2,0).view
    return feat @ wlin.T + blin


if __name__ == "__main__":
    B, T = 2, 8
    V, E, H, L, Z = 20, 16, 32, 2, 8      # vocab, emb_dim, hidden, layers, latent

    key = jax.random.PRNGKey(0)
    ks = jax.random.split(key, 13)
    s = 1.0 / jnp.sqrt(jnp.float32(H))

    def u(k, shape):
        return jax.random.uniform(k, shape, jnp.float32, -s, s)

    emb = 0.1 * jax.random.normal(ks[0], (V, E), jnp.float32)
    wih0 = u(ks[1], (4 * H, E)); whh0 = u(ks[2], (4 * H, H))
    bih0 = u(ks[3], (4 * H,));   bhh0 = u(ks[4], (4 * H,))
    wih1 = u(ks[5], (4 * H, H)); whh1 = u(ks[6], (4 * H, H))
    bih1 = u(ks[7], (4 * H,));   bhh1 = u(ks[8], (4 * H,))
    wlin = u(ks[9], (Z, L * H)); blin = u(ks[10], (Z,))

    x_ids = jax.random.randint(ks[11], (B, T), 0, V, jnp.int32)
    # pack_padded_sequence requires lengths sorted descending (enforce_sorted);
    # the masking-based kernel also accepts unsorted lengths (semantic superset).
    lengths = jnp.array([T, T - 2], dtype=jnp.int32)

    out = encoder_forward(x_ids, lengths, emb,
                          wih0, whh0, bih0, bhh0,
                          wih1, whh1, bih1, bhh1,
                          wlin, blin)
    jax.block_until_ready(out)
    assert out.shape == (B, Z)

    ref = encoder_reference(x_ids, lengths, emb,
                            wih0, whh0, bih0, bhh0,
                            wih1, whh1, bih1, bhh1,
                            wlin, blin)
    assert jnp.allclose(out, ref, rtol=1e-4, atol=1e-4), float(
        jnp.max(jnp.abs(out - ref)))
    print("KERNEL_OK")
</pallas_src>

<mosaic_0001>
module attributes {stable_mosaic.version = 11 : i64} {
  func.func @encoder_kernel(%arg0: memref<8x2x128xf32, #tpu.memory_space<vmem>>, %arg1: memref<2x1xi32, #tpu.memory_space<vmem>>, %arg2: memref<136x256xf32, #tpu.memory_space<vmem>>, %arg3: memref<2x8xf32, #tpu.memory_space<vmem>>) attributes {dimension_semantics = [], scalar_prefetch = 0 : i64, scratch_operands = 0 : i64, tpu.core_type = #tpu.core_type<tc>} {
    %c0 = arith.constant 0 : index
    %c0_0 = arith.constant 0 : index
    %0 = vector.load %arg2[%c0, %c0_0] : memref<136x256xf32, #tpu.memory_space<vmem>>, vector<32x256xf32>
    %c32 = arith.constant 32 : index
    %c0_1 = arith.constant 0 : index
    %1 = vector.load %arg2[%c32, %c0_1] : memref<136x256xf32, #tpu.memory_space<vmem>>, vector<32x128xf32>
    %c64 = arith.constant 64 : index
    %c0_2 = arith.constant 0 : index
    %2 = vector.load %arg2[%c64, %c0_2] : memref<136x256xf32, #tpu.memory_space<vmem>>, vector<32x8xf32>
    %c96 = arith.constant 96 : index
    %c0_3 = arith.constant 0 : index
    %3 = vector.load %arg2[%c96, %c0_3] : memref<136x256xf32, #tpu.memory_space<vmem>>, vector<32x8xf32>
    %c128 = arith.constant 128 : index
    %c0_4 = arith.constant 0 : index
    %4 = vector.load %arg2[%c128, %c0_4] : memref<136x256xf32, #tpu.memory_space<vmem>>, vector<1x128xf32>
    %c129 = arith.constant 129 : index
    %c0_5 = arith.constant 0 : index
    %5 = vector.load %arg2[%c129, %c0_5] : memref<136x256xf32, #tpu.memory_space<vmem>>, vector<1x8xf32>
    %c0_6 = arith.constant 0 : index
    %c0_7 = arith.constant 0 : index
    %6 = vector.load %arg1[%c0_6, %c0_7] : memref<2x1xi32, #tpu.memory_space<vmem>>, vector<2x1xi32>
    %7 = vector.shape_cast %6 : vector<2x1xi32> to vector<2x1xi32>
    %8 = vector.broadcast %7 : vector<2x1xi32> to vector<2x32xi32>
    %c0_i32 = arith.constant 0 : i32
    %9 = vector.broadcast %c0_i32 : i32 to vector<2x32xi32>
    %10 = arith.cmpi sgt, %8, %9 : vector<2x32xi32>
    %c1_i32 = arith.constant 1 : i32
    %11 = vector.broadcast %c1_i32 : i32 to vector<2x32xi32>
    %12 = arith.cmpi sgt, %8, %11 : vector<2x32xi32>
    %c2_i32 = arith.constant 2 : i32
    %13 = vector.broadcast %c2_i32 : i32 to vector<2x32xi32>
    %14 = arith.cmpi sgt, %8, %13 : vector<2x32xi32>
    %c3_i32 = arith.constant 3 : i32
    %15 = vector.broadcast %c3_i32 : i32 to vector<2x32xi32>
    %16 = arith.cmpi sgt, %8, %15 : vector<2x32xi32>
    %c4_i32 = arith.constant 4 : i32
    %17 = vector.broadcast %c4_i32 : i32 to vector<2x32xi32>
    %18 = arith.cmpi sgt, %8, %17 : vector<2x32xi32>
    %c5_i32 = arith.constant 5 : i32
    %19 = vector.broadcast %c5_i32 : i32 to vector<2x32xi32>
    %20 = arith.cmpi sgt, %8, %19 : vector<2x32xi32>
    %c6_i32 = arith.constant 6 : i32
    %21 = vector.broadcast %c6_i32 : i32 to vector<2x32xi32>
    %22 = arith.cmpi sgt, %8, %21 : vector<2x32xi32>
    %c7_i32 = arith.constant 7 : i32
    %23 = vector.broadcast %c7_i32 : i32 to vector<2x32xi32>
    %24 = arith.cmpi sgt, %8, %23 : vector<2x32xi32>
    %cst = arith.constant 0.000000e+00 : f32
    %25 = vector.broadcast %cst : f32 to vector<2x32xf32>
    %c0_8 = arith.constant 0 : index
    %c0_9 = arith.constant 0 : index
    %c0_10 = arith.constant 0 : index
    %26 = vector.load %arg0[%c0_8, %c0_9, %c0_10] : memref<8x2x128xf32, #tpu.memory_space<vmem>>, vector<1x2x128xf32>
    %27 = vector.shape_cast %26 : vector<1x2x128xf32> to vector<2x128xf32>
    %28 = arith.negf %27 : vector<2x128xf32>
    %29 = math.exp %28 : vector<2x128xf32>
    %cst_11 = arith.constant 1.000000e+00 : f32
    %30 = vector.broadcast %cst_11 : f32 to vector<2x128xf32>
    %31 = arith.addf %30, %29 : vector<2x128xf32>
    %32 = arith.divf %30, %31 : vector<2x128xf32>
    %33 = vector.extract_strided_slice %27 {offsets = [0, 96], sizes = [2, 32], strides = [1, 1]} : vector<2x128xf32> to vector<2x32xf32>
    %34 = math.tanh %33 : vector<2x32xf32>
    %35 = vector.extract_strided_slice %32 {offsets = [0, 0], sizes = [2, 32], strides = [1, 1]} : vector<2x128xf32> to vector<2x32xf32>
    %36 = vector.extract_strided_slice %32 {offsets = [0, 32], sizes = [2, 32], strides = [1, 1]} : vector<2x128xf32> to vector<2x32xf32>
    %37 = vector.extract_strided_slice %32 {offsets = [0, 64], sizes = [2, 32], strides = [1, 1]} : vector<2x128xf32> to vector<2x32xf32>
    %38 = arith.mulf %36, %25 : vector<2x32xf32>
    %39 = arith.mulf %35, %34 : vector<2x32xf32>
    %40 = arith.addf %38, %39 : vector<2x32xf32>
    %41 = math.tanh %40 : vector<2x32xf32>
    %42 = arith.mulf %37, %41 : vector<2x32xf32>
    %43 = arith.select %10, %42, %25 : vector<2x32xi1>, vector<2x32xf32>
    %44 = arith.select %10, %40, %25 : vector<2x32xi1>, vector<2x32xf32>
    %cst_12 = arith.constant dense<0.000000e+00> : vector<2x256xf32>
    %45 = tpu.matmul %43, %0, %cst_12 {dimension_numbers = #tpu.dot_dimension_numbers<[1], [0], [0], [1], [0, 0, 1, 1], [], []>} : vector<2x32xf32>, vector<32x256xf32>, vector<2x256xf32> -> vector<2x256xf32>
    %cst_13 = arith.constant dense<0.000000e+00> : vector<2x128xf32>
    %46 = tpu.matmul %25, %1, %cst_13 {dimension_numbers = #tpu.dot_dimension_numbers<[1], [0], [0], [1], [0, 0, 1, 1], [], []>} : vector<2x32xf32>, vector<32x128xf32>, vector<2x128xf32> -> vector<2x128xf32>
    %c1 = arith.constant 1 : index
    %c0_14 = arith.constant 0 : index
    %c0_15 = arith.constant 0 : index
    %47 = vector.load %arg0[%c1, %c0_14, %c0_15] : memref<8x2x128xf32, #tpu.memory_space<vmem>>, vector<1x2x128xf32>
    %48 = vector.shape_cast %47 : vector<1x2x128xf32> to vector<2x128xf32>
    %49 = vector.extract_strided_slice %45 {offsets = [0, 0], sizes = [2, 128], strides = [1, 1]} : vector<2x256xf32> to vector<2x128xf32>
    %50 = arith.addf %48, %49 : vector<2x128xf32>
    %51 = arith.negf %50 : vector<2x128xf32>
    %52 = math.exp %51 : vector<2x128xf32>
    %cst_16 = arith.constant 1.000000e+00 : f32
    %53 = vector.broadcast %cst_16 : f32 to vector<2x128xf32>
    %54 = arith.addf %53, %52 : vector<2x128xf32>
    %55 = arith.divf %53, %54 : vector<2x128xf32>
    %56 = vector.extract_strided_slice %50 {offsets = [0, 96], sizes = [2, 32], strides = [1, 1]} : vector<2x128xf32> to vector<2x32xf32>
    %57 = math.tanh %56 : vector<2x32xf32>
    %58 = vector.extract_strided_slice %55 {offsets = [0, 0], sizes = [2, 32], strides = [1, 1]} : vector<2x128xf32> to vector<2x32xf32>
    %59 = vector.extract_strided_slice %55 {offsets = [0, 32], sizes = [2, 32], strides = [1, 1]} : vector<2x128xf32> to vector<2x32xf32>
    %60 = vector.extract_strided_slice %55 {offsets = [0, 64], sizes = [2, 32], strides = [1, 1]} : vector<2x128xf32> to vector<2x32xf32>
    %61 = arith.mulf %59, %44 : vector<2x32xf32>
    %62 = arith.mulf %58, %57 : vector<2x32xf32>
    %63 = arith.addf %61, %62 : vector<2x32xf32>
    %64 = math.tanh %63 : vector<2x32xf32>
    %65 = arith.mulf %60, %64 : vector<2x32xf32>
    %66 = vector.extract_strided_slice %45 {offsets = [0, 128], sizes = [2, 128], strides = [1, 1]} : vector<2x256xf32> to vector<2x128xf32>
    %67 = arith.addf %66, %46 : vector<2x128xf32>
    %68 = vector.broadcast %4 : vector<1x128xf32> to vector<2x128xf32>
    %69 = arith.addf %67, %68 : vector<2x128xf32>
    %70 = arith.negf %69 : vector<2x128xf32>
    %71 = math.exp %70 : vector<2x128xf32>
    %cst_17 = arith.constant 1.000000e+00 : f32
    %72 = vector.broadcast %cst_17 : f32 to vector<2x128xf32>
    %73 = arith.addf %72, %71 : vector<2x128xf32>
    %74 = arith.divf %72, %73 : vector<2x128xf32>
    %75 = vector.extract_strided_slice %69 {offsets = [0, 96], sizes = [2, 32], strides = [1, 1]} : vector<2x128xf32> to vector<2x32xf32>
    %76 = math.tanh %75 : vector<2x32xf32>
    %77 = vector.extract_strided_slice %74 {offsets = [0, 0], sizes = [2, 32], strides = [1, 1]} : vector<2x128xf32> to vector<2x32xf32>
    %78 = vector.extract_strided_slice %74 {offsets = [0, 32], sizes = [2, 32], strides = [1, 1]} : vector<2x128xf32> to vector<2x32xf32>
    %79 = vector.extract_strided_slice %74 {offsets = [0, 64], sizes = [2, 32], strides = [1, 1]} : vector<2x128xf32> to vector<2x32xf32>
    %80 = arith.mulf %78, %25 : vector<2x32xf32>
    %81 = arith.mulf %77, %76 : vector<2x32xf32>
    %82 = arith.addf %80, %81 : vector<2x32xf32>
    %83 = math.tanh %82 : vector<2x32xf32>
    %84 = arith.mulf %79, %83 : vector<2x32xf32>
    %85 = arith.select %12, %65, %43 : vector<2x32xi1>, vector<2x32xf32>
    %86 = arith.select %12, %63, %44 : vector<2x32xi1>, vector<2x32xf32>
    %87 = arith.select %10, %84, %25 : vector<2x32xi1>, vector<2x32xf32>
    %88 = arith.select %10, %82, %25 : vector<2x32xi1>, vector<2x32xf32>
    %cst_18 = arith.constant dense<0.000000e+00> : vector<2x256xf32>
    %89 = tpu.matmul %85, %0, %cst_18 {dimension_numbers = #tpu.dot_dimension_numbers<[1], [0], [0], [1], [0, 0, 1, 1], [], []>} : vector<2x32xf32>, vector<32x256xf32>, vector<2x256xf32> -> vector<2x256xf32>
    %cst_19 = arith.constant dense<0.000000e+00> : vector<2x128xf32>
    %90 = tpu.matmul %87, %1, %cst_19 {dimension_numbers = #tpu.dot_dimension_numbers<[1], [0], [0], [1], [0, 0, 1, 1], [], []>} : vector<2x32xf32>, vector<32x128xf32>, vector<2x128xf32> -> vector<2x128xf32>
    %c2 = arith.constant 2 : index
    %c0_20 = arith.constant 0 : index
    %c0_21 = arith.constant 0 : index
    %91 = vector.load %arg0[%c2, %c0_20, %c0_21] : memref<8x2x128xf32, #tpu.memory_space<vmem>>, vector<1x2x128xf32>
    %92 = vector.shape_cast %91 : vector<1x2x128xf32> to vector<2x128xf32>
    %93 = vector.extract_strided_slice %89 {offsets = [0, 0], sizes = [2, 128], strides = [1, 1]} : vector<2x256xf32> to vector<2x128xf32>
    %94 = arith.addf %92, %93 : vector<2x128xf32>
    %95 = arith.negf %94 : vector<2x128xf32>
    %96 = math.exp %95 : vector<2x128xf32>
    %cst_22 = arith.constant 1.000000e+00 : f32
    %97 = vector.broadcast %cst_22 : f32 to vector<2x128xf32>
    %98 = arith.addf %97, %96 : vector<2x128xf32>
    %99 = arith.divf %97, %98 : vector<2x128xf32>
    %100 = vector.extract_strided_slice %94 {offsets = [0, 96], sizes = [2, 32], strides = [1, 1]} : vector<2x128xf32> to vector<2x32xf32>
    %101 = math.tanh %100 : vector<2x32xf32>
    %102 = vector.extract_strided_slice %99 {offsets = [0, 0], sizes = [2, 32], strides = [1, 1]} : vector<2x128xf32> to vector<2x32xf32>
    %103 = vector.extract_strided_slice %99 {offsets = [0, 32], sizes = [2, 32], strides = [1, 1]} : vector<2x128xf32> to vector<2x32xf32>
    %104 = vector.extract_strided_slice %99 {offsets = [0, 64], sizes = [2, 32], strides = [1, 1]} : vector<2x128xf32> to vector<2x32xf32>
    %105 = arith.mulf %103, %86 : vector<2x32xf32>
    %106 = arith.mulf %102, %101 : vector<2x32xf32>
    %107 = arith.addf %105, %106 : vector<2x32xf32>
    %108 = math.tanh %107 : vector<2x32xf32>
    %109 = arith.mulf %104, %108 : vector<2x32xf32>
    %110 = vector.extract_strided_slice %89 {offsets = [0, 128], sizes = [2, 128], strides = [1, 1]} : vector<2x256xf32> to vector<2x128xf32>
    %111 = arith.addf %110, %90 : vector<2x128xf32>
    %112 = vector.broadcast %4 : vector<1x128xf32> to vector<2x128xf32>
    %113 = arith.addf %111, %112 : vector<2x128xf32>
    %114 = arith.negf %113 : vector<2x128xf32>
    %115 = math.exp %114 : vector<2x128xf32>
    %cst_23 = arith.constant 1.000000e+00 : f32
    %116 = vector.broadcast %cst_23 : f32 to vector<2x128xf32>
    %117 = arith.addf %116, %115 : vector<2x128xf32>
    %118 = arith.divf %116, %117 : vector<2x128xf32>
    %119 = vector.extract_strided_slice %113 {offsets = [0, 96], sizes = [2, 32], strides = [1, 1]} : vector<2x128xf32> to vector<2x32xf32>
    %120 = math.tanh %119 : vector<2x32xf32>
    %121 = vector.extract_strided_slice %118 {offsets = [0, 0], sizes = [2, 32], strides = [1, 1]} : vector<2x128xf32> to vector<2x32xf32>
    %122 = vector.extract_strided_slice %118 {offsets = [0, 32], sizes = [2, 32], strides = [1, 1]} : vector<2x128xf32> to vector<2x32xf32>
    %123 = vector.extract_strided_slice %118 {offsets = [0, 64], sizes = [2, 32], strides = [1, 1]} : vector<2x128xf32> to vector<2x32xf32>
    %124 = arith.mulf %122, %88 : vector<2x32xf32>
    %125 = arith.mulf %121, %120 : vector<2x32xf32>
    %126 = arith.addf %124, %125 : vector<2x32xf32>
    %127 = math.tanh %126 : vector<2x32xf32>
    %128 = arith.mulf %123, %127 : vector<2x32xf32>
    %129 = arith.select %14, %109, %85 : vector<2x32xi1>, vector<2x32xf32>
    %130 = arith.select %14, %107, %86 : vector<2x32xi1>, vector<2x32xf32>
    %131 = arith.select %12, %128, %87 : vector<2x32xi1>, vector<2x32xf32>
    %132 = arith.select %12, %126, %88 : vector<2x32xi1>, vector<2x32xf32>
    %cst_24 = arith.constant dense<0.000000e+00> : vector<2x256xf32>
    %133 = tpu.matmul %129, %0, %cst_24 {dimension_numbers = #tpu.dot_dimension_numbers<[1], [0], [0], [1], [0, 0, 1, 1], [], []>} : vector<2x32xf32>, vector<32x256xf32>, vector<2x256xf32> -> vector<2x256xf32>
    %cst_25 = arith.constant dense<0.000000e+00> : vector<2x128xf32>
    %134 = tpu.matmul %131, %1, %cst_25 {dimension_numbers = #tpu.dot_dimension_numbers<[1], [0], [0], [1], [0, 0, 1, 1], [], []>} : vector<2x32xf32>, vector<32x128xf32>, vector<2x128xf32> -> vector<2x128xf32>
    %c3 = arith.constant 3 : index
    %c0_26 = arith.constant 0 : index
    %c0_27 = arith.constant 0 : index
    %135 = vector.load %arg0[%c3, %c0_26, %c0_27] : memref<8x2x128xf32, #tpu.memory_space<vmem>>, vector<1x2x128xf32>
    %136 = vector.shape_cast %135 : vector<1x2x128xf32> to vector<2x128xf32>
    %137 = vector.extract_strided_slice %133 {offsets = [0, 0], sizes = [2, 128], strides = [1, 1]} : vector<2x256xf32> to vector<2x128xf32>
    %138 = arith.addf %136, %137 : vector<2x128xf32>
    %139 = arith.negf %138 : vector<2x128xf32>
    %140 = math.exp %139 : vector<2x128xf32>
    %cst_28 = arith.constant 1.000000e+00 : f32
    %141 = vector.broadcast %cst_28 : f32 to vector<2x128xf32>
    %142 = arith.addf %141, %140 : vector<2x128xf32>
    %143 = arith.divf %141, %142 : vector<2x128xf32>
    %144 = vector.extract_strided_slice %138 {offsets = [0, 96], sizes = [2, 32], strides = [1, 1]} : vector<2x128xf32> to vector<2x32xf32>
    %145 = math.tanh %144 : vector<2x32xf32>
    %146 = vector.extract_strided_slice %143 {offsets = [0, 0], sizes = [2, 32], strides = [1, 1]} : vector<2x128xf32> to vector<2x32xf32>
    %147 = vector.extract_strided_slice %143 {offsets = [0, 32], sizes = [2, 32], strides = [1, 1]} : vector<2x128xf32> to vector<2x32xf32>
    %148 = vector.extract_strided_slice %143 {offsets = [0, 64], sizes = [2, 32], strides = [1, 1]} : vector<2x128xf32> to vector<2x32xf32>
    %149 = arith.mulf %147, %130 : vector<2x32xf32>
    %150 = arith.mulf %146, %145 : vector<2x32xf32>
    %151 = arith.addf %149, %150 : vector<2x32xf32>
    %152 = math.tanh %151 : vector<2x32xf32>
    %153 = arith.mulf %148, %152 : vector<2x32xf32>
    %154 = vector.extract_strided_slice %133 {offsets = [0, 128], sizes = [2, 128], strides = [1, 1]} : vector<2x256xf32> to vector<2x128xf32>
    %155 = arith.addf %154, %134 : vector<2x128xf32>
    %156 = vector.broadcast %4 : vector<1x128xf32> to vector<2x128xf32>
    %157 = arith.addf %155, %156 : vector<2x128xf32>
    %158 = arith.negf %157 : vector<2x128xf32>
    %159 = math.exp %158 : vector<2x128xf32>
    %cst_29 = arith.constant 1.000000e+00 : f32
    %160 = vector.broadcast %cst_29 : f32 to vector<2x128xf32>
    %161 = arith.addf %160, %159 : vector<2x128xf32>
    %162 = arith.divf %160, %161 : vector<2x128xf32>
    %163 = vector.extract_strided_slice %157 {offsets = [0, 96], sizes = [2, 32], strides = [1, 1]} : vector<2x128xf32> to vector<2x32xf32>
    %164 = math.tanh %163 : vector<2x32xf32>
    %165 = vector.extract_strided_slice %162 {offsets = [0, 0], sizes = [2, 32], strides = [1, 1]} : vector<2x128xf32> to vector<2x32xf32>
    %166 = vector.extract_strided_slice %162 {offsets = [0, 32], sizes = [2, 32], strides = [1, 1]} : vector<2x128xf32> to vector<2x32xf32>
    %167 = vector.extract_strided_slice %162 {offsets = [0, 64], sizes = [2, 32], strides = [1, 1]} : vector<2x128xf32> to vector<2x32xf32>
    %168 = arith.mulf %166, %132 : vector<2x32xf32>
    %169 = arith.mulf %165, %164 : vector<2x32xf32>
    %170 = arith.addf %168, %169 : vector<2x32xf32>
    %171 = math.tanh %170 : vector<2x32xf32>
    %172 = arith.mulf %167, %171 : vector<2x32xf32>
    %173 = arith.select %16, %153, %129 : vector<2x32xi1>, vector<2x32xf32>
    %174 = arith.select %16, %151, %130 : vector<2x32xi1>, vector<2x32xf32>
    %175 = arith.select %14, %172, %131 : vector<2x32xi1>, vector<2x32xf32>
    %176 = arith.select %14, %170, %132 : vector<2x32xi1>, vector<2x32xf32>
    %cst_30 = arith.constant dense<0.000000e+00> : vector<2x256xf32>
    %177 = tpu.matmul %173, %0, %cst_30 {dimension_numbers = #tpu.dot_dimension_numbers<[1], [0], [0], [1], [0, 0, 1, 1], [], []>} : vector<2x32xf32>, vector<32x256xf32>, vector<2x256xf32> -> vector<2x256xf32>
    %cst_31 = arith.constant dense<0.000000e+00> : vector<2x128xf32>
    %178 = tpu.matmul %175, %1, %cst_31 {dimension_numbers = #tpu.dot_dimension_numbers<[1], [0], [0], [1], [0, 0, 1, 1], [], []>} : vector<2x32xf32>, vector<32x128xf32>, vector<2x128xf32> -> vector<2x128xf32>
    %c4 = arith.constant 4 : index
    %c0_32 = arith.constant 0 : index
    %c0_33 = arith.constant 0 : index
    %179 = vector.load %arg0[%c4, %c0_32, %c0_33] : memref<8x2x128xf32, #tpu.memory_space<vmem>>, vector<1x2x128xf32>
    %180 = vector.shape_cast %179 : vector<1x2x128xf32> to vector<2x128xf32>
    %181 = vector.extract_strided_slice %177 {offsets = [0, 0], sizes = [2, 128], strides = [1, 1]} : vector<2x256xf32> to vector<2x128xf32>
    %182 = arith.addf %180, %181 : vector<2x128xf32>
    %183 = arith.negf %182 : vector<2x128xf32>
    %184 = math.exp %183 : vector<2x128xf32>
    %cst_34 = arith.constant 1.000000e+00 : f32
    %185 = vector.broadcast %cst_34 : f32 to vector<2x128xf32>
    %186 = arith.addf %185, %184 : vector<2x128xf32>
    %187 = arith.divf %185, %186 : vector<2x128xf32>
    %188 = vector.extract_strided_slice %182 {offsets = [0, 96], sizes = [2, 32], strides = [1, 1]} : vector<2x128xf32> to vector<2x32xf32>
    %189 = math.tanh %188 : vector<2x32xf32>
    %190 = vector.extract_strided_slice %187 {offsets = [0, 0], sizes = [2, 32], strides = [1, 1]} : vector<2x128xf32> to vector<2x32xf32>
    %191 = vector.extract_strided_slice %187 {offsets = [0, 32], sizes = [2, 32], strides = [1, 1]} : vector<2x128xf32> to vector<2x32xf32>
    %192 = vector.extract_strided_slice %187 {offsets = [0, 64], sizes = [2, 32], strides = [1, 1]} : vector<2x128xf32> to vector<2x32xf32>
    %193 = arith.mulf %191, %174 : vector<2x32xf32>
    %194 = arith.mulf %190, %189 : vector<2x32xf32>
    %195 = arith.addf %193, %194 : vector<2x32xf32>
    %196 = math.tanh %195 : vector<2x32xf32>
    %197 = arith.mulf %192, %196 : vector<2x32xf32>
    %198 = vector.extract_strided_slice %177 {offsets = [0, 128], sizes = [2, 128], strides = [1, 1]} : vector<2x256xf32> to vector<2x128xf32>
    %199 = arith.addf %198, %178 : vector<2x128xf32>
    %200 = vector.broadcast %4 : vector<1x128xf32> to vector<2x128xf32>
    %201 = arith.addf %199, %200 : vector<2x128xf32>
    %202 = arith.negf %201 : vector<2x128xf32>
    %203 = math.exp %202 : vector<2x128xf32>
    %cst_35 = arith.constant 1.000000e+00 : f32
    %204 = vector.broadcast %cst_35 : f32 to vector<2x128xf32>
    %205 = arith.addf %204, %203 : vector<2x128xf32>
    %206 = arith.divf %204, %205 : vector<2x128xf32>
    %207 = vector.extract_strided_slice %201 {offsets = [0, 96], sizes = [2, 32], strides = [1, 1]} : vector<2x128xf32> to vector<2x32xf32>
    %208 = math.tanh %207 : vector<2x32xf32>
    %209 = vector.extract_strided_slice %206 {offsets = [0, 0], sizes = [2, 32], strides = [1, 1]} : vector<2x128xf32> to vector<2x32xf32>
    %210 = vector.extract_strided_slice %206 {offsets = [0, 32], sizes = [2, 32], strides = [1, 1]} : vector<2x128xf32> to vector<2x32xf32>
    %211 = vector.extract_strided_slice %206 {offsets = [0, 64], sizes = [2, 32], strides = [1, 1]} : vector<2x128xf32> to vector<2x32xf32>
    %212 = arith.mulf %210, %176 : vector<2x32xf32>
    %213 = arith.mulf %209, %208 : vector<2x32xf32>
    %214 = arith.addf %212, %213 : vector<2x32xf32>
    %215 = math.tanh %214 : vector<2x32xf32>
    %216 = arith.mulf %211, %215 : vector<2x32xf32>
    %217 = arith.select %18, %197, %173 : vector<2x32xi1>, vector<2x32xf32>
    %218 = arith.select %18, %195, %174 : vector<2x32xi1>, vector<2x32xf32>
    %219 = arith.select %16, %216, %175 : vector<2x32xi1>, vector<2x32xf32>
    %220 = arith.select %16, %214, %176 : vector<2x32xi1>, vector<2x32xf32>
    %cst_36 = arith.constant dense<0.000000e+00> : vector<2x256xf32>
    %221 = tpu.matmul %217, %0, %cst_36 {dimension_numbers = #tpu.dot_dimension_numbers<[1], [0], [0], [1], [0, 0, 1, 1], [], []>} : vector<2x32xf32>, vector<32x256xf32>, vector<2x256xf32> -> vector<2x256xf32>
    %cst_37 = arith.constant dense<0.000000e+00> : vector<2x128xf32>
    %222 = tpu.matmul %219, %1, %cst_37 {dimension_numbers = #tpu.dot_dimension_numbers<[1], [0], [0], [1], [0, 0, 1, 1], [], []>} : vector<2x32xf32>, vector<32x128xf32>, vector<2x128xf32> -> vector<2x128xf32>
    %c5 = arith.constant 5 : index
    %c0_38 = arith.constant 0 : index
    %c0_39 = arith.constant 0 : index
    %223 = vector.load %arg0[%c5, %c0_38, %c0_39] : memref<8x2x128xf32, #tpu.memory_space<vmem>>, vector<1x2x128xf32>
    %224 = vector.shape_cast %223 : vector<1x2x128xf32> to vector<2x128xf32>
    %225 = vector.extract_strided_slice %221 {offsets = [0, 0], sizes = [2, 128], strides = [1, 1]} : vector<2x256xf32> to vector<2x128xf32>
    %226 = arith.addf %224, %225 : vector<2x128xf32>
    %227 = arith.negf %226 : vector<2x128xf32>
    %228 = math.exp %227 : vector<2x128xf32>
    %cst_40 = arith.constant 1.000000e+00 : f32
    %229 = vector.broadcast %cst_40 : f32 to vector<2x128xf32>
    %230 = arith.addf %229, %228 : vector<2x128xf32>
    %231 = arith.divf %229, %230 : vector<2x128xf32>
    %232 = vector.extract_strided_slice %226 {offsets = [0, 96], sizes = [2, 32], strides = [1, 1]} : vector<2x128xf32> to vector<2x32xf32>
    %233 = math.tanh %232 : vector<2x32xf32>
    %234 = vector.extract_strided_slice %231 {offsets = [0, 0], sizes = [2, 32], strides = [1, 1]} : vector<2x128xf32> to vector<2x32xf32>
    %235 = vector.extract_strided_slice %231 {offsets = [0, 32], sizes = [2, 32], strides = [1, 1]} : vector<2x128xf32> to vector<2x32xf32>
    %236 = vector.extract_strided_slice %231 {offsets = [0, 64], sizes = [2, 32], strides = [1, 1]} : vector<2x128xf32> to vector<2x32xf32>
    %237 = arith.mulf %235, %218 : vector<2x32xf32>
    %238 = arith.mulf %234, %233 : vector<2x32xf32>
    %239 = arith.addf %237, %238 : vector<2x32xf32>
    %240 = math.tanh %239 : vector<2x32xf32>
    %241 = arith.mulf %236, %240 : vector<2x32xf32>
    %242 = vector.extract_strided_slice %221 {offsets = [0, 128], sizes = [2, 128], strides = [1, 1]} : vector<2x256xf32> to vector<2x128xf32>
    %243 = arith.addf %242, %222 : vector<2x128xf32>
    %244 = vector.broadcast %4 : vector<1x128xf32> to vector<2x128xf32>
    %245 = arith.addf %243, %244 : vector<2x128xf32>
    %246 = arith.negf %245 : vector<2x128xf32>
    %247 = math.exp %246 : vector<2x128xf32>
    %cst_41 = arith.constant 1.000000e+00 : f32
    %248 = vector.broadcast %cst_41 : f32 to vector<2x128xf32>
    %249 = arith.addf %248, %247 : vector<2x128xf32>
    %250 = arith.divf %248, %249 : vector<2x128xf32>
    %251 = vector.extract_strided_slice %245 {offsets = [0, 96], sizes = [2, 32], strides = [1, 1]} : vector<2x128xf32> to vector<2x32xf32>
    %252 = math.tanh %251 : vector<2x32xf32>
    %253 = vector.extract_strided_slice %250 {offsets = [0, 0], sizes = [2, 32], strides = [1, 1]} : vector<2x128xf32> to vector<2x32xf32>
    %254 = vector.extract_strided_slice %250 {offsets = [0, 32], sizes = [2, 32], strides = [1, 1]} : vector<2x128xf32> to vector<2x32xf32>
    %255 = vector.extract_strided_slice %250 {offsets = [0, 64], sizes = [2, 32], strides = [1, 1]} : vector<2x128xf32> to vector<2x32xf32>
    %256 = arith.mulf %254, %220 : vector<2x32xf32>
    %257 = arith.mulf %253, %252 : vector<2x32xf32>
    %258 = arith.addf %256, %257 : vector<2x32xf32>
    %259 = math.tanh %258 : vector<2x32xf32>
    %260 = arith.mulf %255, %259 : vector<2x32xf32>
    %261 = arith.select %20, %241, %217 : vector<2x32xi1>, vector<2x32xf32>
    %262 = arith.select %20, %239, %218 : vector<2x32xi1>, vector<2x32xf32>
    %263 = arith.select %18, %260, %219 : vector<2x32xi1>, vector<2x32xf32>
    %264 = arith.select %18, %258, %220 : vector<2x32xi1>, vector<2x32xf32>
    %cst_42 = arith.constant dense<0.000000e+00> : vector<2x256xf32>
    %265 = tpu.matmul %261, %0, %cst_42 {dimension_numbers = #tpu.dot_dimension_numbers<[1], [0], [0], [1], [0, 0, 1, 1], [], []>} : vector<2x32xf32>, vector<32x256xf32>, vector<2x256xf32> -> vector<2x256xf32>
    %cst_43 = arith.constant dense<0.000000e+00> : vector<2x128xf32>
    %266 = tpu.matmul %263, %1, %cst_43 {dimension_numbers = #tpu.dot_dimension_numbers<[1], [0], [0], [1], [0, 0, 1, 1], [], []>} : vector<2x32xf32>, vector<32x128xf32>, vector<2x128xf32> -> vector<2x128xf32>
    %c6 = arith.constant 6 : index
    %c0_44 = arith.constant 0 : index
    %c0_45 = arith.constant 0 : index
    %267 = vector.load %arg0[%c6, %c0_44, %c0_45] : memref<8x2x128xf32, #tpu.memory_space<vmem>>, vector<1x2x128xf32>
    %268 = vector.shape_cast %267 : vector<1x2x128xf32> to vector<2x128xf32>
    %269 = vector.extract_strided_slice %265 {offsets = [0, 0], sizes = [2, 128], strides = [1, 1]} : vector<2x256xf32> to vector<2x128xf32>
    %270 = arith.addf %268, %269 : vector<2x128xf32>
    %271 = arith.negf %270 : vector<2x128xf32>
    %272 = math.exp %271 : vector<2x128xf32>
    %cst_46 = arith.constant 1.000000e+00 : f32
    %273 = vector.broadcast %cst_46 : f32 to vector<2x128xf32>
    %274 = arith.addf %273, %272 : vector<2x128xf32>
    %275 = arith.divf %273, %274 : vector<2x128xf32>
    %276 = vector.extract_strided_slice %270 {offsets = [0, 96], sizes = [2, 32], strides = [1, 1]} : vector<2x128xf32> to vector<2x32xf32>
    %277 = math.tanh %276 : vector<2x32xf32>
    %278 = vector.extract_strided_slice %275 {offsets = [0, 0], sizes = [2, 32], strides = [1, 1]} : vector<2x128xf32> to vector<2x32xf32>
    %279 = vector.extract_strided_slice %275 {offsets = [0, 32], sizes = [2, 32], strides = [1, 1]} : vector<2x128xf32> to vector<2x32xf32>
    %280 = vector.extract_strided_slice %275 {offsets = [0, 64], sizes = [2, 32], strides = [1, 1]} : vector<2x128xf32> to vector<2x32xf32>
    %281 = arith.mulf %279, %262 : vector<2x32xf32>
    %282 = arith.mulf %278, %277 : vector<2x32xf32>
    %283 = arith.addf %281, %282 : vector<2x32xf32>
    %284 = math.tanh %283 : vector<2x32xf32>
    %285 = arith.mulf %280, %284 : vector<2x32xf32>
    %286 = vector.extract_strided_slice %265 {offsets = [0, 128], sizes = [2, 128], strides = [1, 1]} : vector<2x256xf32> to vector<2x128xf32>
    %287 = arith.addf %286, %266 : vector<2x128xf32>
    %288 = vector.broadcast %4 : vector<1x128xf32> to vector<2x128xf32>
    %289 = arith.addf %287, %288 : vector<2x128xf32>
    %290 = arith.negf %289 : vector<2x128xf32>
    %291 = math.exp %290 : vector<2x128xf32>
    %cst_47 = arith.constant 1.000000e+00 : f32
    %292 = vector.broadcast %cst_47 : f32 to vector<2x128xf32>
    %293 = arith.addf %292, %291 : vector<2x128xf32>
    %294 = arith.divf %292, %293 : vector<2x128xf32>
    %295 = vector.extract_strided_slice %289 {offsets = [0, 96], sizes = [2, 32], strides = [1, 1]} : vector<2x128xf32> to vector<2x32xf32>
    %296 = math.tanh %295 : vector<2x32xf32>
    %297 = vector.extract_strided_slice %294 {offsets = [0, 0], sizes = [2, 32], strides = [1, 1]} : vector<2x128xf32> to vector<2x32xf32>
    %298 = vector.extract_strided_slice %294 {offsets = [0, 32], sizes = [2, 32], strides = [1, 1]} : vector<2x128xf32> to vector<2x32xf32>
    %299 = vector.extract_strided_slice %294 {offsets = [0, 64], sizes = [2, 32], strides = [1, 1]} : vector<2x128xf32> to vector<2x32xf32>
    %300 = arith.mulf %298, %264 : vector<2x32xf32>
    %301 = arith.mulf %297, %296 : vector<2x32xf32>
    %302 = arith.addf %300, %301 : vector<2x32xf32>
    %303 = math.tanh %302 : vector<2x32xf32>
    %304 = arith.mulf %299, %303 : vector<2x32xf32>
    %305 = arith.select %22, %285, %261 : vector<2x32xi1>, vector<2x32xf32>
    %306 = arith.select %22, %283, %262 : vector<2x32xi1>, vector<2x32xf32>
    %307 = arith.select %20, %304, %263 : vector<2x32xi1>, vector<2x32xf32>
    %308 = arith.select %20, %302, %264 : vector<2x32xi1>, vector<2x32xf32>
    %cst_48 = arith.constant dense<0.000000e+00> : vector<2x256xf32>
    %309 = tpu.matmul %305, %0, %cst_48 {dimension_numbers = #tpu.dot_dimension_numbers<[1], [0], [0], [1], [0, 0, 1, 1], [], []>} : vector<2x32xf32>, vector<32x256xf32>, vector<2x256xf32> -> vector<2x256xf32>
    %cst_49 = arith.constant dense<0.000000e+00> : vector<2x128xf32>
    %310 = tpu.matmul %307, %1, %cst_49 {dimension_numbers = #tpu.dot_dimension_numbers<[1], [0], [0], [1], [0, 0, 1, 1], [], []>} : vector<2x32xf32>, vector<32x128xf32>, vector<2x128xf32> -> vector<2x128xf32>
    %c7 = arith.constant 7 : index
    %c0_50 = arith.constant 0 : index
    %c0_51 = arith.constant 0 : index
    %311 = vector.load %arg0[%c7, %c0_50, %c0_51] : memref<8x2x128xf32, #tpu.memory_space<vmem>>, vector<1x2x128xf32>
    %312 = vector.shape_cast %311 : vector<1x2x128xf32> to vector<2x128xf32>
    %313 = vector.extract_strided_slice %309 {offsets = [0, 0], sizes = [2, 128], strides = [1, 1]} : vector<2x256xf32> to vector<2x128xf32>
    %314 = arith.addf %312, %313 : vector<2x128xf32>
    %315 = arith.negf %314 : vector<2x128xf32>
    %316 = math.exp %315 : vector<2x128xf32>
    %cst_52 = arith.constant 1.000000e+00 : f32
    %317 = vector.broadcast %cst_52 : f32 to vector<2x128xf32>
    %318 = arith.addf %317, %316 : vector<2x128xf32>
    %319 = arith.divf %317, %318 : vector<2x128xf32>
    %320 = vector.extract_strided_slice %314 {offsets = [0, 96], sizes = [2, 32], strides = [1, 1]} : vector<2x128xf32> to vector<2x32xf32>
    %321 = math.tanh %320 : vector<2x32xf32>
    %322 = vector.extract_strided_slice %319 {offsets = [0, 0], sizes = [2, 32], strides = [1, 1]} : vector<2x128xf32> to vector<2x32xf32>
    %323 = vector.extract_strided_slice %319 {offsets = [0, 32], sizes = [2, 32], strides = [1, 1]} : vector<2x128xf32> to vector<2x32xf32>
    %324 = vector.extract_strided_slice %319 {offsets = [0, 64], sizes = [2, 32], strides = [1, 1]} : vector<2x128xf32> to vector<2x32xf32>
    %325 = arith.mulf %323, %306 : vector<2x32xf32>
    %326 = arith.mulf %322, %321 : vector<2x32xf32>
    %327 = arith.addf %325, %326 : vector<2x32xf32>
    %328 = math.tanh %327 : vector<2x32xf32>
    %329 = arith.mulf %324, %328 : vector<2x32xf32>
    %330 = vector.extract_strided_slice %309 {offsets = [0, 128], sizes = [2, 128], strides = [1, 1]} : vector<2x256xf32> to vector<2x128xf32>
    %331 = arith.addf %330, %310 : vector<2x128xf32>
    %332 = vector.broadcast %4 : vector<1x128xf32> to vector<2x128xf32>
    %333 = arith.addf %331, %332 : vector<2x128xf32>
    %334 = arith.negf %333 : vector<2x128xf32>
    %335 = math.exp %334 : vector<2x128xf32>
    %cst_53 = arith.constant 1.000000e+00 : f32
    %336 = vector.broadcast %cst_53 : f32 to vector<2x128xf32>
    %337 = arith.addf %336, %335 : vector<2x128xf32>
    %338 = arith.divf %336, %337 : vector<2x128xf32>
    %339 = vector.extract_strided_slice %333 {offsets = [0, 96], sizes = [2, 32], strides = [1, 1]} : vector<2x128xf32> to vector<2x32xf32>
    %340 = math.tanh %339 : vector<2x32xf32>
    %341 = vector.extract_strided_slice %338 {offsets = [0, 0], sizes = [2, 32], strides = [1, 1]} : vector<2x128xf32> to vector<2x32xf32>
    %342 = vector.extract_strided_slice %338 {offsets = [0, 32], sizes = [2, 32], strides = [1, 1]} : vector<2x128xf32> to vector<2x32xf32>
    %343 = vector.extract_strided_slice %338 {offsets = [0, 64], sizes = [2, 32], strides = [1, 1]} : vector<2x128xf32> to vector<2x32xf32>
    %344 = arith.mulf %342, %308 : vector<2x32xf32>
    %345 = arith.mulf %341, %340 : vector<2x32xf32>
    %346 = arith.addf %344, %345 : vector<2x32xf32>
    %347 = math.tanh %346 : vector<2x32xf32>
    %348 = arith.mulf %343, %347 : vector<2x32xf32>
    %349 = arith.select %24, %329, %305 : vector<2x32xi1>, vector<2x32xf32>
    %350 = arith.select %24, %327, %306 : vector<2x32xi1>, vector<2x32xf32>
    %351 = arith.select %22, %348, %307 : vector<2x32xi1>, vector<2x32xf32>
    %352 = arith.select %22, %346, %308 : vector<2x32xi1>, vector<2x32xf32>
    %353 = vector.extract_strided_slice %0 {offsets = [0, 128], sizes = [32, 128], strides = [1, 1]} : vector<32x256xf32> to vector<32x128xf32>
    %cst_54 = arith.constant dense<0.000000e+00> : vector<2x128xf32>
    %354 = tpu.matmul %349, %353, %cst_54 {dimension_numbers = #tpu.dot_dimension_numbers<[1], [0], [0], [1], [0, 0, 1, 1], [], []>} : vector<2x32xf32>, vector<32x128xf32>, vector<2x128xf32> -> vector<2x128xf32>
    %cst_55 = arith.constant dense<0.000000e+00> : vector<2x128xf32>
    %355 = tpu.matmul %351, %1, %cst_55 {dimension_numbers = #tpu.dot_dimension_numbers<[1], [0], [0], [1], [0, 0, 1, 1], [], []>} : vector<2x32xf32>, vector<32x128xf32>, vector<2x128xf32> -> vector<2x128xf32>
    %356 = arith.addf %354, %355 : vector<2x128xf32>
    %357 = vector.broadcast %4 : vector<1x128xf32> to vector<2x128xf32>
    %358 = arith.addf %356, %357 : vector<2x128xf32>
    %359 = arith.negf %358 : vector<2x128xf32>
    %360 = math.exp %359 : vector<2x128xf32>
    %cst_56 = arith.constant 1.000000e+00 : f32
    %361 = vector.broadcast %cst_56 : f32 to vector<2x128xf32>
    %362 = arith.addf %361, %360 : vector<2x128xf32>
    %363 = arith.divf %361, %362 : vector<2x128xf32>
    %364 = vector.extract_strided_slice %358 {offsets = [0, 96], sizes = [2, 32], strides = [1, 1]} : vector<2x128xf32> to vector<2x32xf32>
    %365 = math.tanh %364 : vector<2x32xf32>
    %366 = vector.extract_strided_slice %363 {offsets = [0, 0], sizes = [2, 32], strides = [1, 1]} : vector<2x128xf32> to vector<2x32xf32>
    %367 = vector.extract_strided_slice %363 {offsets = [0, 32], sizes = [2, 32], strides = [1, 1]} : vector<2x128xf32> to vector<2x32xf32>
    %368 = arith.mulf %367, %352 : vector<2x32xf32>
    %369 = arith.mulf %366, %365 : vector<2x32xf32>
    %370 = arith.addf %368, %369 : vector<2x32xf32>
    %371 = arith.select %24, %370, %352 : vector<2x32xi1>, vector<2x32xf32>
    %cst_57 = arith.constant dense<0.000000e+00> : vector<2x8xf32>
    %372 = tpu.matmul %350, %2, %cst_57 {dimension_numbers = #tpu.dot_dimension_numbers<[1], [0], [0], [1], [0, 0, 1, 1], [], []>} : vector<2x32xf32>, vector<32x8xf32>, vector<2x8xf32> -> vector<2x8xf32>
    %cst_58 = arith.constant dense<0.000000e+00> : vector<2x8xf32>
    %373 = tpu.matmul %371, %3, %cst_58 {dimension_numbers = #tpu.dot_dimension_numbers<[1], [0], [0], [1], [0, 0, 1, 1], [], []>} : vector<2x32xf32>, vector<32x8xf32>, vector<2x8xf32> -> vector<2x8xf32>
    %374 = arith.addf %372, %373 : vector<2x8xf32>
    %375 = vector.broadcast %5 : vector<1x8xf32> to vector<2x8xf32>
    %376 = arith.addf %374, %375 : vector<2x8xf32>
    %c0_59 = arith.constant 0 : index
    %c0_60 = arith.constant 0 : index
    %377 = vector.load %arg3[%c0_59, %c0_60] : memref<2x8xf32, #tpu.memory_space<vmem>>, vector<2x8xf32>
    tpu.vector_store %arg3[%c0_59, %c0_60], %376 {strides = array<i32>} : memref<2x8xf32, #tpu.memory_space<vmem>>, vector<2x8xf32>,
    return
  }
}

</mosaic_0001>

<bundles_post_ra>
// kernel: tpu_custom_call.1
= control target key start
LH: loop header
LB: loop body
LE: loop exit
PB: predicated region body
PF: predicated region fallthrough
CT: control target
= control target key end

     0   :  { %8 = vsyncpa [#allocation3], 0  ;;  %s2939_s0 = inlined_call_operand.hbm [shape: f32[8,2,128], index: 0, kind: input, shape index: {}]   ;;  %s2940_s1 = inlined_call_operand.vmem [shape: s32[2,1], index: 1, kind: input, shape index: {}]   ;;  %s2941_s2 = inlined_call_operand.hbm [shape: f32[136,256], index: 2, kind: input, shape index: {}]   ;;  %s2942_s3 = inlined_call_operand.hbm [shape: f32[2,8], index: 3, kind: output, shape index: {}]  }
   0x1   :  { %9 = vsyncpa [#allocation6], 0 }
   0x2   :  { %10 = vsyncpa [#allocation4], 0  ;;  %s2442_s12 = smov [#allocation2]   ;;  %s2370_s16 = scalar_lea.hbm %s2939_s0, 256 }
   0x3   :  { %s16_s13 = sshll.u32 %s2442_s12, 4  ;;  %p2371_p0 = scmp.ne.s32.totalorder %s2939_s0, %s2370_s16  ;;  %s17_s13 = int_to_ptr.vmem [resolvable:$true] %s16_s13 }
   0x4   :  { %p2374_p1 = scmp.lt.u32.totalorder %s2370_s16, %s2939_s0 }
   0x6   :  { %p2376_p2 = pnand %p2374_p1, %p2371_p0 }
   0x8   :  { %2379 = shalt.err (!%p2376_p2)
}
   0x9   :  { %s2380_s21 = scalar_lea.vmem %s17_s13, 256  ;;  %p2385_p4 = scmp.lt.s32.totalorder %s17_s13, %s17_s13 }
   0xa   :  { %p2381_p3 = scmp.ne.s32.totalorder %s17_s13, %s2380_s21  ;;  %p2386_p5 = scmp.lt.s32.totalorder %s2380_s21, %s2380_s21 }
   0xc   :  { %p2387_p6 = por %p2386_p5, %p2385_p4 }
   0xe   :  { %p2388_p7 = pnand %p2387_p6, %p2381_p3 }
  0x10   :  { %2391 = shalt.err (!%p2388_p7)
}
  0x11   :  { %s2443_s22 = smov 32   ;;  %s2444_s23 = smov 2  }
  0x12   :  { %22 = dma.hbm_to_vmem [thread:$0]  %s2939_s0, 256, %s17_s13, [#allocation3], %s2443_s22, %s2443_s22, %s2444_s23  }
  0x13   :  { %s2445_s26 = smov [#allocation5]   ;;  %s2392_s30 = scalar_lea.hbm %s2941_s2, 4352 }
  0x14   :  { %s30_s27 = sshll.u32 %s2445_s26, 4  ;;  %p2393_p8 = scmp.ne.s32.totalorder %s2941_s2, %s2392_s30  ;;  %s31_s27 = int_to_ptr.vmem [resolvable:$true] %s30_s27 }
  0x15   :  { %p2396_p9 = scmp.lt.u32.totalorder %s2392_s30, %s2941_s2 }
  0x17   :  { %p2398_p10 = pnand %p2396_p9, %p2393_p8 }
  0x19   :  { %2401 = shalt.err (!%p2398_p10)
}
  0x1a   :  { %s2402_s8 = scalar_lea.vmem %s31_s27, 4352  ;;  %p2407_p12 = scmp.lt.s32.totalorder %s31_s27, %s31_s27 }
  0x1b   :  { %p2403_p11 = scmp.ne.s32.totalorder %s31_s27, %s2402_s8  ;;  %p2408_p13 = scmp.lt.s32.totalorder %s2402_s8, %s2402_s8 }
  0x1d   :  { %p2409_p0 = por %p2408_p13, %p2407_p12 }
  0x1f   :  { %p2410_p1 = pnand %p2409_p0, %p2403_p11 }
  0x21   :  { %2413 = shalt.err (!%p2410_p1)
}
  0x22   :  { %s2446_s0 = smov 256   ;;  %s2447_s9 = smov 16  }
  0x23   :  { %36 = dma.hbm_to_vmem [thread:$0]  %s2941_s2, 4352, %s31_s27, [#allocation6], %s2446_s0, %s2446_s0, %s2447_s9  }
  0x24   :  { %2436 = dma.done.wait [#allocation3], 256  }
  0x25   :  { %2437 = vsyncadd [#allocation3], 4294967040 }
  0x26   :  { %2438 = dma.done.wait [#allocation6], 4352  }
  0x27   :  { %2439 = vsyncadd [#allocation6], 4294962944  ;;  %v2448_v0 = vmov 0   ;;  %v77_v1 = vld [vmem:[#allocation2] sm:$0x3]  ;;  %v44_v13 = vld [vmem:[#allocation5 + $0x8] sm:$0xff] }
  0x28   :  { %2242 = vset.pattern.permute.xlu1 %v2448_v0  ;;  %2243 = vset.pattern.permute.xlu0 %v2448_v0  ;;  %v65_v2 = vld [vmem:[%s2940_s1] sm:$0x3]  ;;  %2244 = vtanh.f32 %v77_v1  ;;  %v1898_v4 = vmul.f32 -1.442695, %v77_v1  ;;  %v46_v14 = vld [vmem:[#allocation5 + $0x18] sm:$0xff]  ;;  %v43_v15 = vld [vmem:[#allocation5] sm:$0xff] }
  0x29   :  { %67 = vperm.xlu1 %2242, %v65_v2   ;;  %v2509_v16 = vpack.c.bf16 %v46_v14, %v44_v13  ;;  %v2449_v17 = vmov 0.0|0.0   ;;  %v45_v18 = vld [vmem:[#allocation5 + $0x10] sm:$0xff]  ;;  %v51_v19 = vld [vmem:[#allocation5 + $0x40] sm:$0xff]  ;;  %v2450_v21 = vmov 0.0   ;;  %v48_v24 = vld [vmem:[#allocation5 + $0x28] sm:$0xff]  ;;  %vm2451_vm0 = vmmov 0  }
  0x2a   :  { %2246 = vpow2.f32 %v1898_v4  ;;  %2115 = vmatprep.subr.bf16.mxu1 %v2449_v17  ;;  %v52_v20 = vld [vmem:[#allocation5 + $0x50] sm:$0xff]  ;;  %174 = vmatprep.mubr.f32.mxu0 %v2450_v21  ;;  %v2513_v22 = vpack.c.bf16 %v45_v18, %v43_v15  ;;  %v50_v25 = vld [vmem:[#allocation5 + $0x38] sm:$0xff]  ;;  %v47_v26 = vld [vmem:[#allocation5 + $0x20] sm:$0xff]  ;;  %s2452_s1 = smov 64   ;;  %vm107_vm2 = vcmask 261120   ;;  %s2453_s2 = smov 96  }
  0x2b   :  { %v2515_v23 = vpack.c.bf16 %v52_v20, %v51_v19  ;;  %1994 = vmatprep.mubr.msk.f32.mxu1 %vm2451_vm0, %v2450_v21  ;;  %2108 = vmatprep.subr.bf16.mxu0 %v2509_v16  ;;  %v2520_v27 = vpack.c.bf16 %v50_v25, %v48_v24  ;;  %v49_v28 = vld [vmem:[#allocation5 + $0x30] sm:$0xff]  ;;  %v53_v29 = vld [vmem:[#allocation5 + $0x60] sm:$0xff]  ;;  %s2454_s14 = smov [#allocation7]   ;;  %vm1880_vm10 = vcmask 58368  }
  0x2c   :  { %v54_v30 = vld [vmem:[#allocation5 + $0x70] sm:$0xff]  ;;  %2110 = vmatpush1.bf16.msra.mxu0 %v2513_v22  ;;  %v2524_v31 = vpack.c.bf16 %v49_v28, %v47_v26  ;;  %v2554_v44 = vld [vmem:[#allocation5 + $0x100] ss:$0 sm:$0xff]  ;;  %s1888_s15 = sshll.u32 %s2454_s14, 4  ;;  %s1889_s15 = int_to_ptr.vmem [resolvable:$true] %s1888_s15 }
  0x2d   :  { %2117 = vmatpush3.bf16.msra.mxu1 %v2515_v23  ;;  %v2526_v32 = vpack.c.bf16 %v54_v30, %v53_v29  ;;  %2112 = vmatprep.subr.bf16.mxu0 %v2520_v27  ;;  %v255_v41 = vld [vmem:[#allocation2 + $0x2] sm:$0x3]  ;;  %v463_v15 = vld [vmem:[#allocation2 + $0x4] sm:$0x3]  ;;  %s2414_s16 = scalar_lea.vmem %s1889_s15, 32  ;;  %p2419_p3 = scmp.lt.s32.totalorder %s1889_s15, %s1889_s15 }
  0x2e   :  { %2118 = vmatprep.subr.bf16.mxu1 %v2449_v17  ;;  %p2415_p2 = scmp.ne.s32.totalorder %s1889_s15, %s2414_s16  ;;  %p2420_p4 = scmp.lt.s32.totalorder %s2414_s16, %s2414_s16 }
  0x30   :  { %2114 = vmatpush1.bf16.msra.mxu0 %v2524_v31  ;;  %p2421_p5 = por %p2420_p4, %p2419_p3 }
  0x31   :  { %2120 = vmatpush3.bf16.msra.mxu1 %v2526_v32  ;;  %2122 = vmatprep.subr.bf16.mxu0 %v2509_v16 }
  0x32   :  { %v2245_v3 = vpop.eup %2244  ;;  %2129 = vmatprep.subr.bf16.mxu1 %v2449_v17  ;;  %p2422_p6 = pnand %p2421_p5, %p2415_p2 }
  0x33   :  { %87 = vrot.lane.b32.xlu0 %v2245_v3, %s2443_s22 }
  0x34   :  { %v2247_v5 = vpop.eup %2246  ;;  %1995 = vmatmul.mubr.f32.vlgmr.msra.gmra.mrb[0].mxu1 %v2450_v21 }
  0x35   :  { %v81_v6 = vadd.f32 1.0, %v2247_v5  ;;  %2131 = vmatpush3.bf16.msra.mxu1 %v2515_v23  ;;  %2005 = vmatprep.mubr.msk.f32.mxu1 %vm2451_vm0, %v2450_v21 }
  0x36   :  { %2132 = vmatprep.subr.bf16.mxu1 %v2449_v17 }
  0x37   :  { %2248 = vrcp.f32 %v81_v6 }
  0x39   :  { %2134 = vmatpush3.bf16.msra.mxu1 %v2526_v32 }
  0x3a   :  { %2143 = vmatprep.subr.bf16.mxu1 %v2449_v17 }
  0x41   :  { %v2249_v7 = vpop.eup %2248 }
  0x42   :  { %v85_v10 = vmul.f32 0.0, %v2249_v7 }
  0xa5   :  { %v88_v8 = vpop.permute.xlu0 %87 }
  0xa6   :  { %v90_v9 = vmul.f32 %v2249_v7, %v88_v8 }
  0xa8   :  { %92 = vrot.lane.b32.xlu0 %v90_v9, %s2443_s22  ;;  %v2542_v34 = vpop.permute.xlu1 %67 }
  0xa9   :  { %vm69_vm1 = vcmp.gt.s32.totalorder %v2542_v34, 0  ;;  %vm70_vm3 = vcmp.gt.s32.totalorder %v2542_v34, 1  ;;  %vm71_vm4 = vcmp.gt.s32.totalorder %v2542_v34, 2  ;;  %vm72_vm5 = vcmp.gt.s32.totalorder %v2542_v34, 3 }
  0xaa   :  { %vm73_vm6 = vcmp.gt.s32.totalorder %v2542_v34, 4  ;;  %vm74_vm7 = vcmp.gt.s32.totalorder %v2542_v34, 5  ;;  %vm75_vm8 = vcmp.gt.s32.totalorder %v2542_v34, 6  ;;  %vm76_vm9 = vcmp.gt.s32.totalorder %v2542_v34, 7 }
 0x107   :  { %v250_v39 = vpop.f32.mrb[0].mxu1 }
 0x108   :  { %v1996_v40 = vpop.f32.mrb[1].mxu1 }
 0x11a   :  { %v93_v11 = vpop.permute.xlu0 %92 }
 0x11b   :  { %v2506_v12 = vadd.f32 %v93_v11, %v85_v10 }
 0x11d   :  { %2250 = vtanh.f32 %v2506_v12  ;;  %v2564_v62 = vsel %vm69_vm1, %v2506_v12, 0.0 }
 0x127   :  { %v2251_v33 = vpop.eup %2250 }
 0x128   :  { %98 = vrot.lane.b32.xlu1 %v2251_v33, %s2443_s22 }
 0x19a   :  { %v99_v35 = vpop.permute.xlu1 %98 }
 0x19b   :  { %v101_v36 = vmul.f32 %v2249_v7, %v99_v35 }
 0x19d   :  { %v102_v37 = vsel %vm69_vm1, %v101_v36, 0.0 }
 0x19e   :  { %105 = vrot.lane.b32.xlu0 %v102_v37, %s2452_s1 }
 0x210   :  { %v106_v38 = vpop.permute.xlu0 %105 }
 0x211   :  { %1899 = vmatmul.mubr.msk.f32.vlgmr.msra.gmra.mrb[0].mxu0 %vm107_vm2, %v106_v38 }
 0x212   :  { %2124 = vmatpush1.bf16.msra.mxu0 %v2513_v22  ;;  %380 = vmatprep.mubr.f32.mxu0 %v2450_v21 }
 0x213   :  { %2126 = vmatprep.subr.bf16.mxu0 %v2520_v27 }
 0x216   :  { %2128 = vmatpush1.bf16.msra.mxu0 %v2524_v31 }
 0x217   :  { %2136 = vmatprep.subr.bf16.mxu0 %v2509_v16 }
 0x2e4   :  { %v176_v42 = vpop.f32.mrb[0].mxu0 }
 0x2e5   :  { %v256_v43 = vadd.f32 %v255_v41, %v176_v42  ;;  %v178_v45 = vpop.f32.mrb[1].mxu0 }
 0x2e6   :  { %v281_v46 = vadd.f32 %v250_v39, %v178_v45 }
 0x2e7   :  { %2252 = vtanh.f32 %v256_v43  ;;  %v1900_v50 = vmul.f32 -1.442695, %v256_v43 }
 0x2e8   :  { %v282_v47 = vadd.f32 %v281_v46, %v2554_v44 }
 0x2ea   :  { %2254 = vtanh.f32 %v282_v47  ;;  %v1901_v51 = vmul.f32 -1.442695, %v282_v47 }
 0x2eb   :  { %2256 = vpow2.f32 %v1900_v50 }
 0x2ec   :  { %2258 = vpow2.f32 %v1901_v51 }
 0x2f1   :  { %v2253_v48 = vpop.eup %2252 }
 0x2f2   :  { %266 = vrot.lane.b32.xlu1 %v2253_v48, %s2443_s22 }
 0x2f4   :  { %v2255_v49 = vpop.eup %2254 }
 0x2f5   :  { %292 = vrot.lane.b32.xlu0 %v2255_v49, %s2443_s22  ;;  %v2257_v52 = vpop.eup %2256 }
 0x2f6   :  { %v2259_v53 = vpop.eup %2258  ;;  %v260_v54 = vadd.f32 1.0, %v2257_v52 }
 0x2f7   :  { %v286_v55 = vadd.f32 1.0, %v2259_v53 }
 0x2f8   :  { %2260 = vrcp.f32 %v260_v54 }
 0x2f9   :  { %2262 = vrcp.f32 %v286_v55 }
 0x302   :  { %v2261_v56 = vpop.eup %2260 }
 0x303   :  { %v2263_v59 = vpop.eup %2262  ;;  %v264_v63 = vmul.f32 %v2261_v56, %v2564_v62 }
 0x304   :  { %v290_v2 = vmul.f32 0.0, %v2263_v59 }
 0x364   :  { %v267_v57 = vpop.permute.xlu1 %266 }
 0x365   :  { %v269_v58 = vmul.f32 %v2261_v56, %v267_v57 }
 0x367   :  { %271 = vrot.lane.b32.xlu1 %v269_v58, %s2443_s22  ;;  %v293_v60 = vpop.permute.xlu0 %292 }
 0x368   :  { %v295_v61 = vmul.f32 %v2263_v59, %v293_v60 }
 0x36a   :  { %297 = vrot.lane.b32.xlu0 %v295_v61, %s2443_s22 }
 0x3d9   :  { %v272_v0 = vpop.permute.xlu1 %271 }
 0x3da   :  { %v2567_v1 = vadd.f32 %v272_v0, %v264_v63 }
 0x3dc   :  { %2264 = vtanh.f32 %v2567_v1  ;;  %v298_v3 = vpop.permute.xlu0 %297  ;;  %v2610_v47 = vsel %vm70_vm3, %v2567_v1, %v2564_v62  ;;  %v671_v1 = vld [vmem:[#allocation2 + $0x6] sm:$0x3] }
 0x3dd   :  { %v2570_v4 = vadd.f32 %v298_v3, %v290_v2 }
 0x3df   :  { %2266 = vtanh.f32 %v2570_v4  ;;  %v2618_v51 = vsel %vm69_vm1, %v2570_v4, 0.0 }
 0x3e6   :  { %v2265_v5 = vpop.eup %2264 }
 0x3e7   :  { %277 = vrot.lane.b32.xlu1 %v2265_v5, %s2443_s22 }
 0x3e9   :  { %v2267_v6 = vpop.eup %2266 }
 0x3ea   :  { %303 = vrot.lane.b32.xlu0 %v2267_v6, %s2443_s22 }
 0x459   :  { %v278_v7 = vpop.permute.xlu1 %277 }
 0x45a   :  { %v280_v8 = vmul.f32 %v2261_v56, %v278_v7 }
 0x45c   :  { %v304_v9 = vpop.permute.xlu0 %303  ;;  %v2578_v10 = vsel %vm70_vm3, %v280_v8, %v102_v37 }
 0x45d   :  { %v306_v11 = vmul.f32 %v2263_v59, %v304_v9  ;;  %312 = vrot.lane.b32.xlu1 %v2578_v10, %s2452_s1 }
 0x45f   :  { %v2584_v12 = vsel %vm69_vm1, %v306_v11, 0.0 }
 0x460   :  { %388 = vrot.lane.b32.xlu0 %v2584_v12, %s2452_s1 }
 0x4cf   :  { %v313_v13 = vpop.permute.xlu1 %312 }
 0x4d0   :  { %1902 = vmatmul.mubr.msk.f32.vlgmr.msra.gmra.mrb[2].mxu0 %vm107_vm2, %v313_v13 }
 0x4d1   :  { %2138 = vmatpush1.bf16.msra.mxu0 %v2513_v22  ;;  %588 = vmatprep.mubr.f32.mxu0 %v2450_v21 }
 0x4d2   :  { %v389_v14 = vpop.permute.xlu0 %388  ;;  %2140 = vmatprep.subr.bf16.mxu0 %v2520_v27 }
 0x4d3   :  { %2006 = vmatmul.mubr.msk.f32.vlgmr.msra.gmra.mrb[2].mxu1 %vm107_vm2, %v389_v14 }
 0x4d4   :  { %2145 = vmatpush3.bf16.msra.mxu1 %v2515_v23  ;;  %2016 = vmatprep.mubr.msk.f32.mxu1 %vm2451_vm0, %v2450_v21 }
 0x4d5   :  { %2142 = vmatpush1.bf16.msra.mxu0 %v2524_v31  ;;  %2146 = vmatprep.subr.bf16.mxu1 %v2449_v17 }
 0x4d6   :  { %2150 = vmatprep.subr.bf16.mxu0 %v2509_v16 }
 0x4d8   :  { %2148 = vmatpush3.bf16.msra.mxu1 %v2526_v32 }
 0x4d9   :  { %2157 = vmatprep.subr.bf16.mxu1 %v2449_v17 }
 0x5a3   :  { %v382_v18 = vpop.f32.mrb[2].mxu0 }
 0x5a4   :  { %v464_v19 = vadd.f32 %v463_v15, %v382_v18  ;;  %v384_v20 = vpop.f32.mrb[3].mxu0 }
 0x5a6   :  { %2268 = vtanh.f32 %v464_v19  ;;  %v458_v24 = vpop.f32.mrb[2].mxu1  ;;  %v1904_v33 = vmul.f32 -1.442695, %v464_v19 }
 0x5a7   :  { %v489_v25 = vadd.f32 %v458_v24, %v384_v20  ;;  %v2007_v26 = vpop.f32.mrb[3].mxu1 }
 0x5a9   :  { %v490_v28 = vadd.f32 %v489_v25, %v2554_v44 }
 0x5ab   :  { %2270 = vtanh.f32 %v490_v28  ;;  %v1905_v35 = vmul.f32 -1.442695, %v490_v28 }
 0x5ac   :  { %2272 = vpow2.f32 %v1904_v33 }
 0x5ad   :  { %2274 = vpow2.f32 %v1905_v35 }
 0x5b0   :  { %v2269_v29 = vpop.eup %2268 }
 0x5b1   :  { %474 = vrot.lane.b32.xlu1 %v2269_v29, %s2443_s22 }
 0x5b5   :  { %v2271_v30 = vpop.eup %2270 }
 0x5b6   :  { %500 = vrot.lane.b32.xlu0 %v2271_v30, %s2443_s22  ;;  %v2273_v36 = vpop.eup %2272 }
 0x5b7   :  { %v468_v37 = vadd.f32 1.0, %v2273_v36  ;;  %v2275_v38 = vpop.eup %2274 }
 0x5b8   :  { %v494_v39 = vadd.f32 1.0, %v2275_v38 }
 0x5b9   :  { %2276 = vrcp.f32 %v468_v37 }
 0x5ba   :  { %2278 = vrcp.f32 %v494_v39 }
 0x5c3   :  { %v2277_v40 = vpop.eup %2276 }
 0x5c4   :  { %v2279_v43 = vpop.eup %2278  ;;  %v472_v48 = vmul.f32 %v2277_v40, %v2610_v47 }
 0x5c5   :  { %v498_v52 = vmul.f32 %v2279_v43, %v2618_v51 }
 0x623   :  { %v475_v41 = vpop.permute.xlu1 %474 }
 0x624   :  { %v477_v42 = vmul.f32 %v2277_v40, %v475_v41 }
 0x626   :  { %479 = vrot.lane.b32.xlu1 %v477_v42, %s2443_s22 }
 0x628   :  { %v501_v45 = vpop.permute.xlu0 %500 }
 0x629   :  { %v503_v46 = vmul.f32 %v2279_v43, %v501_v45 }
 0x62b   :  { %505 = vrot.lane.b32.xlu0 %v503_v46, %s2443_s22 }
 0x698   :  { %v480_v49 = vpop.permute.xlu1 %479 }
 0x699   :  { %v2613_v50 = vadd.f32 %v480_v49, %v472_v48 }
 0x69b   :  { %2280 = vtanh.f32 %v2613_v50  ;;  %v2664_v29 = vsel %vm71_vm4, %v2613_v50, %v2610_v47 }
 0x69d   :  { %v506_v53 = vpop.permute.xlu0 %505 }
 0x69e   :  { %v2622_v54 = vadd.f32 %v506_v53, %v498_v52 }
 0x6a0   :  { %2282 = vtanh.f32 %v2622_v54  ;;  %v2674_v36 = vsel %vm70_vm3, %v2622_v54, %v2618_v51  ;;  %v879_v51 = vld [vmem:[#allocation2 + $0x8] sm:$0x3] }
 0x6a5   :  { %v2281_v55 = vpop.eup %2280 }
 0x6a6   :  { %485 = vrot.lane.b32.xlu1 %v2281_v55, %s2443_s22 }
 0x6aa   :  { %v2283_v56 = vpop.eup %2282 }
 0x6ab   :  { %511 = vrot.lane.b32.xlu0 %v2283_v56, %s2443_s22 }
 0x718   :  { %v486_v57 = vpop.permute.xlu1 %485 }
 0x719   :  { %v488_v58 = vmul.f32 %v2277_v40, %v486_v57 }
 0x71b   :  { %v2631_v59 = vsel %vm71_vm4, %v488_v58, %v2578_v10 }
 0x71c   :  { %520 = vrot.lane.b32.xlu1 %v2631_v59, %s2452_s1 }
 0x71d   :  { %v512_v60 = vpop.permute.xlu0 %511 }
 0x71e   :  { %v514_v61 = vmul.f32 %v2279_v43, %v512_v60 }
 0x720   :  { %v2638_v62 = vsel %vm70_vm3, %v514_v61, %v2584_v12 }
 0x721   :  { %596 = vrot.lane.b32.xlu0 %v2638_v62, %s2452_s1 }
 0x78e   :  { %v521_v63 = vpop.permute.xlu1 %520 }
 0x78f   :  { %1906 = vmatmul.mubr.msk.f32.vlgmr.msra.gmra.mrb[4].mxu0 %vm107_vm2, %v521_v63 }
 0x790   :  { %2152 = vmatpush1.bf16.msra.mxu0 %v2513_v22  ;;  %796 = vmatprep.mubr.f32.mxu0 %v2450_v21 }
 0x791   :  { %2154 = vmatprep.subr.bf16.mxu0 %v2520_v27 }
 0x793   :  { %v597_v0 = vpop.permute.xlu0 %596 }
 0x794   :  { %2017 = vmatmul.mubr.msk.f32.vlgmr.msra.gmra.mrb[4].mxu1 %vm107_vm2, %v597_v0  ;;  %2156 = vmatpush1.bf16.msra.mxu0 %v2524_v31 }
 0x795   :  { %2159 = vmatpush3.bf16.msra.mxu1 %v2515_v23  ;;  %2027 = vmatprep.mubr.msk.f32.mxu1 %vm2451_vm0, %v2450_v21 }
 0x796   :  { %2160 = vmatprep.subr.bf16.mxu1 %v2449_v17  ;;  %2164 = vmatprep.subr.bf16.mxu0 %v2509_v16 }
 0x799   :  { %2162 = vmatpush3.bf16.msra.mxu1 %v2526_v32 }
 0x79a   :  { %2171 = vmatprep.subr.bf16.mxu1 %v2449_v17 }
 0x862   :  { %v590_v2 = vpop.f32.mrb[4].mxu0 }
 0x863   :  { %v672_v3 = vadd.f32 %v671_v1, %v590_v2  ;;  %v592_v4 = vpop.f32.mrb[5].mxu0 }
 0x865   :  { %2284 = vtanh.f32 %v672_v3  ;;  %v1908_v11 = vmul.f32 -1.442695, %v672_v3 }
 0x867   :  { %v666_v5 = vpop.f32.mrb[4].mxu1 }
 0x868   :  { %v697_v6 = vadd.f32 %v666_v5, %v592_v4  ;;  %v2018_v7 = vpop.f32.mrb[5].mxu1 }
 0x86a   :  { %v698_v8 = vadd.f32 %v697_v6, %v2554_v44 }
 0x86c   :  { %2286 = vtanh.f32 %v698_v8  ;;  %v1909_v12 = vmul.f32 -1.442695, %v698_v8 }
 0x86d   :  { %2288 = vpow2.f32 %v1908_v11 }
 0x86e   :  { %2290 = vpow2.f32 %v1909_v12 }
 0x86f   :  { %v2285_v9 = vpop.eup %2284 }
 0x870   :  { %682 = vrot.lane.b32.xlu1 %v2285_v9, %s2443_s22 }
 0x876   :  { %v2287_v10 = vpop.eup %2286 }
 0x877   :  { %708 = vrot.lane.b32.xlu0 %v2287_v10, %s2443_s22  ;;  %v2289_v13 = vpop.eup %2288 }
 0x878   :  { %v676_v14 = vadd.f32 1.0, %v2289_v13  ;;  %v2291_v15 = vpop.eup %2290 }
 0x879   :  { %v702_v18 = vadd.f32 1.0, %v2291_v15 }
 0x87a   :  { %2292 = vrcp.f32 %v676_v14 }
 0x87b   :  { %2294 = vrcp.f32 %v702_v18 }
 0x884   :  { %v2293_v19 = vpop.eup %2292 }
 0x885   :  { %v2295_v25 = vpop.eup %2294  ;;  %v680_v30 = vmul.f32 %v2293_v19, %v2664_v29 }
 0x886   :  { %v706_v37 = vmul.f32 %v2295_v25, %v2674_v36 }
 0x8e2   :  { %v683_v20 = vpop.permute.xlu1 %682 }
 0x8e3   :  { %v685_v24 = vmul.f32 %v2293_v19, %v683_v20 }
 0x8e5   :  { %687 = vrot.lane.b32.xlu1 %v685_v24, %s2443_s22 }
 0x8e9   :  { %v709_v26 = vpop.permute.xlu0 %708 }
 0x8ea   :  { %v711_v28 = vmul.f32 %v2295_v25, %v709_v26 }
 0x8ec   :  { %713 = vrot.lane.b32.xlu0 %v711_v28, %s2443_s22 }
 0x957   :  { %v688_v33 = vpop.permute.xlu1 %687 }
 0x958   :  { %v2667_v35 = vadd.f32 %v688_v33, %v680_v30 }
 0x95a   :  { %2296 = vtanh.f32 %v2667_v35  ;;  %v2719_v9 = vsel %vm72_vm5, %v2667_v35, %v2664_v29 }
 0x95e   :  { %v714_v38 = vpop.permute.xlu0 %713 }
 0x95f   :  { %v2677_v39 = vadd.f32 %v714_v38, %v706_v37 }
 0x961   :  { %2298 = vtanh.f32 %v2677_v39  ;;  %v2729_v13 = vsel %vm71_vm4, %v2677_v39, %v2674_v36  ;;  %v1087_v36 = vld [vmem:[#allocation2 + $0xa] sm:$0x3] }
 0x964   :  { %v2297_v40 = vpop.eup %2296 }
 0x965   :  { %693 = vrot.lane.b32.xlu1 %v2297_v40, %s2443_s22 }
 0x96b   :  { %v2299_v41 = vpop.eup %2298 }
 0x96c   :  { %719 = vrot.lane.b32.xlu0 %v2299_v41, %s2443_s22 }
 0x9d7   :  { %v694_v42 = vpop.permute.xlu1 %693 }
 0x9d8   :  { %v696_v43 = vmul.f32 %v2293_v19, %v694_v42 }
 0x9da   :  { %v2686_v45 = vsel %vm72_vm5, %v696_v43, %v2631_v59 }
 0x9db   :  { %728 = vrot.lane.b32.xlu1 %v2686_v45, %s2452_s1 }
 0x9de   :  { %v720_v46 = vpop.permute.xlu0 %719 }
 0x9df   :  { %v722_v47 = vmul.f32 %v2295_v25, %v720_v46 }
 0x9e1   :  { %v2693_v48 = vsel %vm71_vm4, %v722_v47, %v2638_v62 }
 0x9e2   :  { %804 = vrot.lane.b32.xlu0 %v2693_v48, %s2452_s1 }
 0xa4d   :  { %v729_v49 = vpop.permute.xlu1 %728 }
 0xa4e   :  { %1910 = vmatmul.mubr.msk.f32.vlgmr.msra.gmra.mrb[6].mxu0 %vm107_vm2, %v729_v49 }
 0xa4f   :  { %2166 = vmatpush1.bf16.msra.mxu0 %v2513_v22  ;;  %1004 = vmatprep.mubr.f32.mxu0 %v2450_v21 }
 0xa50   :  { %2168 = vmatprep.subr.bf16.mxu0 %v2520_v27 }
 0xa53   :  { %2170 = vmatpush1.bf16.msra.mxu0 %v2524_v31 }
 0xa54   :  { %v805_v50 = vpop.permute.xlu0 %804  ;;  %2178 = vmatprep.subr.bf16.mxu0 %v2509_v16 }
 0xa55   :  { %2028 = vmatmul.mubr.msk.f32.vlgmr.msra.gmra.mrb[6].mxu1 %vm107_vm2, %v805_v50 }
 0xa56   :  { %2173 = vmatpush3.bf16.msra.mxu1 %v2515_v23  ;;  %2038 = vmatprep.mubr.msk.f32.mxu1 %vm2451_vm0, %v2450_v21 }
 0xa57   :  { %2174 = vmatprep.subr.bf16.mxu1 %v2449_v17 }
 0xa5a   :  { %2176 = vmatpush3.bf16.msra.mxu1 %v2526_v32 }
 0xa5b   :  { %2185 = vmatprep.subr.bf16.mxu1 %v2449_v17 }
 0xb21   :  { %v798_v52 = vpop.f32.mrb[6].mxu0 }
 0xb22   :  { %v880_v53 = vadd.f32 %v879_v51, %v798_v52  ;;  %v800_v54 = vpop.f32.mrb[7].mxu0 }
 0xb24   :  { %2300 = vtanh.f32 %v880_v53  ;;  %v1912_v61 = vmul.f32 -1.442695, %v880_v53 }
 0xb28   :  { %v874_v55 = vpop.f32.mrb[6].mxu1 }
 0xb29   :  { %v905_v56 = vadd.f32 %v874_v55, %v800_v54  ;;  %v2029_v57 = vpop.f32.mrb[7].mxu1 }
 0xb2b   :  { %v906_v58 = vadd.f32 %v905_v56, %v2554_v44 }
 0xb2d   :  { %2302 = vtanh.f32 %v906_v58  ;;  %v1913_v62 = vmul.f32 -1.442695, %v906_v58 }
 0xb2e   :  { %v2301_v59 = vpop.eup %2300  ;;  %2304 = vpow2.f32 %v1912_v61 }
 0xb2f   :  { %890 = vrot.lane.b32.xlu1 %v2301_v59, %s2443_s22  ;;  %2306 = vpow2.f32 %v1913_v62 }
 0xb37   :  { %v2303_v60 = vpop.eup %2302 }
 0xb38   :  { %916 = vrot.lane.b32.xlu0 %v2303_v60, %s2443_s22  ;;  %v2305_v63 = vpop.eup %2304 }
 0xb39   :  { %v884_v0 = vadd.f32 1.0, %v2305_v63  ;;  %v2307_v1 = vpop.eup %2306 }
 0xb3a   :  { %v910_v2 = vadd.f32 1.0, %v2307_v1 }
 0xb3b   :  { %2308 = vrcp.f32 %v884_v0 }
 0xb3c   :  { %2310 = vrcp.f32 %v910_v2 }
 0xb45   :  { %v2309_v3 = vpop.eup %2308 }
 0xb46   :  { %v2311_v6 = vpop.eup %2310  ;;  %v888_v10 = vmul.f32 %v2309_v3, %v2719_v9 }
 0xb47   :  { %v914_v14 = vmul.f32 %v2311_v6, %v2729_v13 }
 0xba1   :  { %v891_v4 = vpop.permute.xlu1 %890 }
 0xba2   :  { %v893_v5 = vmul.f32 %v2309_v3, %v891_v4 }
 0xba4   :  { %895 = vrot.lane.b32.xlu1 %v893_v5, %s2443_s22 }
 0xbaa   :  { %v917_v7 = vpop.permute.xlu0 %916 }
 0xbab   :  { %v919_v8 = vmul.f32 %v2311_v6, %v917_v7 }
 0xbad   :  { %921 = vrot.lane.b32.xlu0 %v919_v8, %s2443_s22 }
 0xc16   :  { %v896_v11 = vpop.permute.xlu1 %895 }
 0xc17   :  { %v2722_v12 = vadd.f32 %v896_v11, %v888_v10 }
 0xc19   :  { %2312 = vtanh.f32 %v2722_v12  ;;  %v2774_v59 = vsel %vm73_vm6, %v2722_v12, %v2719_v9 }
 0xc1f   :  { %v922_v15 = vpop.permute.xlu0 %921 }
 0xc20   :  { %v2732_v18 = vadd.f32 %v922_v15, %v914_v14 }
 0xc22   :  { %2314 = vtanh.f32 %v2732_v18  ;;  %v2784_v63 = vsel %vm72_vm5, %v2732_v18, %v2729_v13 }
 0xc23   :  { %v2313_v19 = vpop.eup %2312 }
 0xc24   :  { %901 = vrot.lane.b32.xlu1 %v2313_v19, %s2443_s22 }
 0xc2c   :  { %v2315_v20 = vpop.eup %2314 }
 0xc2d   :  { %927 = vrot.lane.b32.xlu0 %v2315_v20, %s2443_s22 }
 0xc96   :  { %v902_v24 = vpop.permute.xlu1 %901 }
 0xc97   :  { %v904_v25 = vmul.f32 %v2309_v3, %v902_v24 }
 0xc99   :  { %v2741_v26 = vsel %vm73_vm6, %v904_v25, %v2686_v45 }
 0xc9a   :  { %936 = vrot.lane.b32.xlu1 %v2741_v26, %s2452_s1 }
 0xc9f   :  { %v928_v28 = vpop.permute.xlu0 %927 }
 0xca0   :  { %v930_v29 = vmul.f32 %v2311_v6, %v928_v28 }
 0xca2   :  { %v2748_v30 = vsel %vm72_vm5, %v930_v29, %v2693_v48 }
 0xca3   :  { %1012 = vrot.lane.b32.xlu0 %v2748_v30, %s2452_s1 }
 0xd0c   :  { %v937_v33 = vpop.permute.xlu1 %936 }
 0xd0d   :  { %1914 = vmatmul.mubr.msk.f32.vlgmr.msra.gmra.mrb[8].mxu0 %vm107_vm2, %v937_v33 }
 0xd0e   :  { %2180 = vmatpush1.bf16.msra.mxu0 %v2513_v22  ;;  %1212 = vmatprep.mubr.f32.mxu0 %v2450_v21 }
 0xd0f   :  { %2182 = vmatprep.subr.bf16.mxu0 %v2520_v27 }
 0xd12   :  { %2184 = vmatpush1.bf16.msra.mxu0 %v2524_v31 }
 0xd13   :  { %2192 = vmatprep.subr.bf16.mxu0 %v2509_v16 }
 0xd15   :  { %v1013_v35 = vpop.permute.xlu0 %1012 }
 0xd16   :  { %2039 = vmatmul.mubr.msk.f32.vlgmr.msra.gmra.mrb[8].mxu1 %vm107_vm2, %v1013_v35 }
 0xd17   :  { %2187 = vmatpush3.bf16.msra.mxu1 %v2515_v23  ;;  %2049 = vmatprep.mubr.msk.f32.mxu1 %vm2451_vm0, %v2450_v21 }
 0xd18   :  { %2188 = vmatprep.subr.bf16.mxu1 %v2449_v17 }
 0xd1b   :  { %2190 = vmatpush3.bf16.msra.mxu1 %v2526_v32 }
 0xd1c   :  { %2199 = vmatprep.subr.bf16.mxu1 %v2449_v17 }
 0xde0   :  { %v1006_v37 = vpop.f32.mrb[8].mxu0 }
 0xde1   :  { %v1088_v38 = vadd.f32 %v1087_v36, %v1006_v37  ;;  %v1008_v39 = vpop.f32.mrb[9].mxu0 }
 0xde3   :  { %2316 = vtanh.f32 %v1088_v38  ;;  %v1916_v47 = vmul.f32 -1.442695, %v1088_v38 }
 0xde9   :  { %v1082_v40 = vpop.f32.mrb[8].mxu1 }
 0xdea   :  { %v1113_v41 = vadd.f32 %v1082_v40, %v1008_v39  ;;  %v2040_v42 = vpop.f32.mrb[9].mxu1 }
 0xdec   :  { %v1114_v43 = vadd.f32 %v1113_v41, %v2554_v44 }
 0xded   :  { %v2317_v45 = vpop.eup %2316 }
 0xdee   :  { %2318 = vtanh.f32 %v1114_v43  ;;  %1098 = vrot.lane.b32.xlu1 %v2317_v45, %s2443_s22  ;;  %v1917_v48 = vmul.f32 -1.442695, %v1114_v43 }
 0xdef   :  { %2320 = vpow2.f32 %v1916_v47 }
 0xdf0   :  { %2322 = vpow2.f32 %v1917_v48 }
 0xdf8   :  { %v2319_v46 = vpop.eup %2318 }
 0xdf9   :  { %1124 = vrot.lane.b32.xlu0 %v2319_v46, %s2443_s22  ;;  %v2321_v49 = vpop.eup %2320 }
 0xdfa   :  { %v1092_v50 = vadd.f32 1.0, %v2321_v49  ;;  %v2323_v51 = vpop.eup %2322 }
 0xdfb   :  { %v1118_v52 = vadd.f32 1.0, %v2323_v51 }
 0xdfc   :  { %2324 = vrcp.f32 %v1092_v50 }
 0xdfd   :  { %2326 = vrcp.f32 %v1118_v52 }
 0xe06   :  { %v2325_v53 = vpop.eup %2324 }
 0xe07   :  { %v2327_v56 = vpop.eup %2326  ;;  %v1096_v60 = vmul.f32 %v2325_v53, %v2774_v59 }
 0xe08   :  { %v1122_v0 = vmul.f32 %v2327_v56, %v2784_v63 }
 0xe60   :  { %v1099_v54 = vpop.permute.xlu1 %1098 }
 0xe61   :  { %v1101_v55 = vmul.f32 %v2325_v53, %v1099_v54 }
 0xe63   :  { %1103 = vrot.lane.b32.xlu1 %v1101_v55, %s2443_s22 }
 0xe6b   :  { %v1125_v57 = vpop.permute.xlu0 %1124 }
 0xe6c   :  { %v1127_v58 = vmul.f32 %v2327_v56, %v1125_v57 }
 0xe6e   :  { %1129 = vrot.lane.b32.xlu0 %v1127_v58, %s2443_s22 }
 0xed5   :  { %v1104_v61 = vpop.permute.xlu1 %1103 }
 0xed6   :  { %v2777_v62 = vadd.f32 %v1104_v61, %v1096_v60 }
 0xed8   :  { %2328 = vtanh.f32 %v2777_v62  ;;  %v2829_v42 = vsel %vm74_vm7, %v2777_v62, %v2774_v59 }
 0xee0   :  { %v1130_v1 = vpop.permute.xlu0 %1129 }
 0xee1   :  { %v2787_v2 = vadd.f32 %v1130_v1, %v1122_v0 }
 0xee2   :  { %v2329_v3 = vpop.eup %2328 }
 0xee3   :  { %2330 = vtanh.f32 %v2787_v2  ;;  %1109 = vrot.lane.b32.xlu1 %v2329_v3, %s2443_s22  ;;  %v2839_v47 = vsel %vm73_vm6, %v2787_v2, %v2784_v63 }
 0xeed   :  { %v2331_v4 = vpop.eup %2330 }
 0xeee   :  { %1135 = vrot.lane.b32.xlu0 %v2331_v4, %s2443_s22 }
 0xf55   :  { %v1110_v5 = vpop.permute.xlu1 %1109 }
 0xf56   :  { %v1112_v6 = vmul.f32 %v2325_v53, %v1110_v5 }
 0xf58   :  { %v2796_v7 = vsel %vm74_vm7, %v1112_v6, %v2741_v26 }
 0xf59   :  { %1144 = vrot.lane.b32.xlu1 %v2796_v7, %s2452_s1 }
 0xf60   :  { %v1136_v8 = vpop.permute.xlu0 %1135 }
 0xf61   :  { %v1138_v9 = vmul.f32 %v2327_v56, %v1136_v8 }
 0xf63   :  { %v2803_v10 = vsel %vm73_vm6, %v1138_v9, %v2748_v30 }
 0xf64   :  { %1220 = vrot.lane.b32.xlu0 %v2803_v10, %s2452_s1 }
 0xfcb   :  { %v1145_v11 = vpop.permute.xlu1 %1144 }
 0xfcc   :  { %1918 = vmatmul.mubr.msk.f32.vlgmr.msra.gmra.mrb[10].mxu0 %vm107_vm2, %v1145_v11 }
 0xfcd   :  { %2194 = vmatpush1.bf16.msra.mxu0 %v2513_v22  ;;  %1420 = vmatprep.mubr.f32.mxu0 %v2450_v21  ;;  %v1295_v22 = vld [vmem:[#allocation2 + $0xc] sm:$0x3] }
 0xfce   :  { %2196 = vmatprep.subr.bf16.mxu0 %v2520_v27 }
 0xfd1   :  { %2198 = vmatpush1.bf16.msra.mxu0 %v2524_v31 }
 0xfd2   :  { %2205 = vmatprep.subr.bf16.mxu0 %v2449_v17 }
 0xfd6   :  { %v1221_v12 = vpop.permute.xlu0 %1220 }
 0xfd7   :  { %2050 = vmatmul.mubr.msk.f32.vlgmr.msra.gmra.mrb[10].mxu1 %vm107_vm2, %v1221_v12 }
 0xfd8   :  { %2201 = vmatpush3.bf16.msra.mxu1 %v2515_v23  ;;  %2060 = vmatprep.mubr.msk.f32.mxu1 %vm2451_vm0, %v2450_v21 }
 0xfd9   :  { %2202 = vmatprep.subr.bf16.mxu1 %v2449_v17 }
 0xfdc   :  { %2204 = vmatpush3.bf16.msra.mxu1 %v2526_v32 }
 0xfdd   :  { %2211 = vmatprep.subr.bf16.mxu1 %v2449_v17 }
0x109f   :  { %v1214_v13 = vpop.f32.mrb[10].mxu0 }
0x10a0   :  { %v1296_v14 = vadd.f32 %v1295_v22, %v1214_v13  ;;  %v1216_v31 = vpop.f32.mrb[11].mxu0 }
0x10a2   :  { %2332 = vtanh.f32 %v1296_v14  ;;  %v1920_v26 = vmul.f32 -1.442695, %v1296_v14 }
0x10aa   :  { %v1290_v15 = vpop.f32.mrb[10].mxu1 }
0x10ab   :  { %v1321_v18 = vadd.f32 %v1290_v15, %v1216_v31  ;;  %v2051_v19 = vpop.f32.mrb[11].mxu1 }
0x10ac   :  { %v2333_v20 = vpop.eup %2332 }
0x10ad   :  { %v1322_v24 = vadd.f32 %v1321_v18, %v2554_v44  ;;  %1306 = vrot.lane.b32.xlu1 %v2333_v20, %s2443_s22 }
0x10af   :  { %2334 = vtanh.f32 %v1322_v24  ;;  %v1921_v28 = vmul.f32 -1.442695, %v1322_v24 }
0x10b0   :  { %2336 = vpow2.f32 %v1920_v26 }
0x10b1   :  { %2338 = vpow2.f32 %v1921_v28 }
0x10b9   :  { %v2335_v25 = vpop.eup %2334 }
0x10ba   :  { %1332 = vrot.lane.b32.xlu0 %v2335_v25, %s2443_s22  ;;  %v2337_v29 = vpop.eup %2336 }
0x10bb   :  { %v1300_v30 = vadd.f32 1.0, %v2337_v29  ;;  %v2339_v33 = vpop.eup %2338 }
0x10bc   :  { %v1326_v35 = vadd.f32 1.0, %v2339_v33 }
0x10bd   :  { %2340 = vrcp.f32 %v1300_v30 }
0x10be   :  { %2342 = vrcp.f32 %v1326_v35 }
0x10c7   :  { %v2341_v36 = vpop.eup %2340 }
0x10c8   :  { %v2343_v39 = vpop.eup %2342  ;;  %v1304_v43 = vmul.f32 %v2341_v36, %v2829_v42 }
0x10c9   :  { %v1330_v48 = vmul.f32 %v2343_v39, %v2839_v47 }
0x111f   :  { %v1307_v37 = vpop.permute.xlu1 %1306 }
0x1120   :  { %v1309_v38 = vmul.f32 %v2341_v36, %v1307_v37 }
0x1122   :  { %1311 = vrot.lane.b32.xlu1 %v1309_v38, %s2443_s22 }
0x112c   :  { %v1333_v40 = vpop.permute.xlu0 %1332 }
0x112d   :  { %v1335_v41 = vmul.f32 %v2343_v39, %v1333_v40 }
0x112f   :  { %1337 = vrot.lane.b32.xlu0 %v1335_v41, %s2443_s22 }
0x1194   :  { %v1312_v45 = vpop.permute.xlu1 %1311 }
0x1195   :  { %v2832_v46 = vadd.f32 %v1312_v45, %v1304_v43 }
0x1197   :  { %2344 = vtanh.f32 %v2832_v46  ;;  %v2885_v14 = vsel %vm75_vm8, %v2832_v46, %v2829_v42 }
0x11a1   :  { %v2345_v49 = vpop.eup %2344  ;;  %v1338_v50 = vpop.permute.xlu0 %1337 }
0x11a2   :  { %v2842_v51 = vadd.f32 %v1338_v50, %v1330_v48  ;;  %1317 = vrot.lane.b32.xlu1 %v2345_v49, %s2443_s22  ;;  %v56_v48 = vld [vmem:[#allocation5 + $0x90] sm:$0xff] }
0x11a4   :  { %2346 = vtanh.f32 %v2842_v51  ;;  %v1350_v20 = vsel %vm74_vm7, %v2842_v51, %v2839_v47  ;;  %v55_v47 = vld [vmem:[#allocation5 + $0x80] sm:$0xff] }
0x11a5   :  { %v2224_v49 = vpack.c.bf16 %v56_v48, %v55_v47 }
0x11ae   :  { %v2347_v52 = vpop.eup %2346 }
0x11af   :  { %1343 = vrot.lane.b32.xlu0 %v2347_v52, %s2443_s22 }
0x1214   :  { %v1318_v53 = vpop.permute.xlu1 %1317 }
0x1215   :  { %v1320_v54 = vmul.f32 %v2341_v36, %v1318_v53  ;;  %v57_v53 = vld [vmem:[#allocation5 + $0xa0] sm:$0xff] }
0x1217   :  { %v2851_v55 = vsel %vm75_vm8, %v1320_v54, %v2796_v7  ;;  %v58_v54 = vld [vmem:[#allocation5 + $0xb0] sm:$0xff] }
0x1218   :  { %1352 = vrot.lane.b32.xlu1 %v2851_v55, %s2452_s1 }
0x1221   :  { %v1344_v56 = vpop.permute.xlu0 %1343 }
0x1222   :  { %v1346_v57 = vmul.f32 %v2343_v39, %v1344_v56  ;;  %v60_v56 = vld [vmem:[#allocation5 + $0xd0] sm:$0xff] }
0x1224   :  { %v2858_v58 = vsel %vm74_vm7, %v1346_v57, %v2803_v10  ;;  %v61_v57 = vld [vmem:[#allocation5 + $0xe0] sm:$0xff] }
0x1225   :  { %1428 = vrot.lane.b32.xlu0 %v2858_v58, %s2452_s1 }
0x128a   :  { %v1353_v59 = vpop.permute.xlu1 %1352 }
0x128b   :  { %1922 = vmatmul.mubr.msk.f32.vlgmr.msra.gmra.mrb[12].mxu0 %vm107_vm2, %v1353_v59  ;;  %v62_v59 = vld [vmem:[#allocation5 + $0xf0] sm:$0xff] }
0x128c   :  { %2207 = vmatpush3.bf16.msra.mxu0 %v2515_v23  ;;  %2071 = vmatprep.mubr.msk.f32.mxu0 %vm2451_vm0, %v2450_v21  ;;  %v1503_v23 = vld [vmem:[#allocation2 + $0xe] sm:$0x3] }
0x128d   :  { %2208 = vmatprep.subr.bf16.mxu0 %v2449_v17 }
0x1290   :  { %2210 = vmatpush3.bf16.msra.mxu0 %v2526_v32 }
0x1291   :  { %2217 = vmatprep.subr.bf16.mxu0 %v2449_v17 }
0x1297   :  { %v1429_v60 = vpop.permute.xlu0 %1428 }
0x1298   :  { %2061 = vmatmul.mubr.msk.f32.vlgmr.msra.gmra.mrb[12].mxu1 %vm107_vm2, %v1429_v60  ;;  %v2221_v60 = vpack.c.bf16 %v62_v59, %v61_v57 }
0x1299   :  { %2213 = vmatpush3.bf16.msra.mxu1 %v2509_v16  ;;  %2082 = vmatprep.mubr.msk.f32.mxu1 %vm2451_vm0, %v2450_v21 }
0x129a   :  { %2214 = vmatprep.subr.bf16.mxu1 %v2449_v17 }
0x129d   :  { %2216 = vmatpush3.bf16.msra.mxu1 %v2520_v27 }
0x129e   :  { %2223 = vmatprep.subr.bf16.mxu1 %v2449_v17 }
0x135e   :  { %v1422_v61 = vpop.f32.mrb[12].mxu0 }
0x135f   :  { %v1504_v62 = vadd.f32 %v1503_v23, %v1422_v61  ;;  %v1424_v32 = vpop.f32.mrb[13].mxu0 }
0x1361   :  { %2348 = vtanh.f32 %v1504_v62  ;;  %v1924_v27 = vmul.f32 -1.442695, %v1504_v62 }
0x136b   :  { %v2349_v63 = vpop.eup %2348  ;;  %v1498_v0 = vpop.f32.mrb[12].mxu1 }
0x136c   :  { %v1529_v1 = vadd.f32 %v1498_v0, %v1424_v32  ;;  %1514 = vrot.lane.b32.xlu1 %v2349_v63, %s2443_s22  ;;  %v2062_v16 = vpop.f32.mrb[13].mxu1 }
0x136e   :  { %v1530_v2 = vadd.f32 %v1529_v1, %v2554_v44 }
0x1370   :  { %2350 = vtanh.f32 %v1530_v2  ;;  %v1925_v5 = vmul.f32 -1.442695, %v1530_v2 }
0x1371   :  { %2352 = vpow2.f32 %v1924_v27 }
0x1372   :  { %2354 = vpow2.f32 %v1925_v5  ;;  %v64_v5 = vld [vmem:[#allocation5 + $0x101] ss:$0 sm:$0xff] }
0x137a   :  { %v2351_v3 = vpop.eup %2350 }
0x137b   :  { %1540 = vrot.lane.b32.xlu0 %v2351_v3, %s2443_s22  ;;  %v2353_v4 = vpop.eup %2352 }
0x137c   :  { %v1508_v6 = vadd.f32 1.0, %v2353_v4  ;;  %v2355_v7 = vpop.eup %2354 }
0x137d   :  { %v1534_v11 = vadd.f32 1.0, %v2355_v7 }
0x137e   :  { %2356 = vrcp.f32 %v1508_v6 }
0x137f   :  { %2358 = vrcp.f32 %v1534_v11 }
0x1388   :  { %v2357_v8 = vpop.eup %2356 }
0x1389   :  { %v2359_v12 = vpop.eup %2358  ;;  %v1512_v31 = vmul.f32 %v2357_v8, %v2885_v14 }
0x138a   :  { %v1538_v24 = vmul.f32 %v2359_v12, %v1350_v20 }
0x13de   :  { %v1515_v9 = vpop.permute.xlu1 %1514 }
0x13df   :  { %v1517_v10 = vmul.f32 %v2357_v8, %v1515_v9 }
0x13e1   :  { %1519 = vrot.lane.b32.xlu1 %v1517_v10, %s2443_s22 }
0x13ed   :  { %v1541_v22 = vpop.permute.xlu0 %1540 }
0x13ee   :  { %v1543_v13 = vmul.f32 %v2359_v12, %v1541_v22 }
0x13f0   :  { %1545 = vrot.lane.b32.xlu0 %v1543_v13, %s2443_s22 }
0x1453   :  { %v1520_v15 = vpop.permute.xlu1 %1519 }
0x1454   :  { %v2888_v18 = vadd.f32 %v1520_v15, %v1512_v31 }
0x1456   :  { %2360 = vtanh.f32 %v2888_v18  ;;  %v1556_v32 = vsel %vm76_vm9, %v2888_v18, %v2885_v14 }
0x1460   :  { %v2361_v19 = vpop.eup %2360 }
0x1461   :  { %1525 = vrot.lane.b32.xlu1 %v2361_v19, %s2443_s22 }
0x1462   :  { %v1546_v25 = vpop.permute.xlu0 %1545 }
0x1463   :  { %v1548_v26 = vadd.f32 %v1546_v25, %v1538_v24 }
0x1465   :  { %2362 = vtanh.f32 %v1548_v26  ;;  %v1558_v63 = vsel %vm75_vm8, %v1548_v26, %v1350_v20 }
0x146f   :  { %v2363_v28 = vpop.eup %2362 }
0x1470   :  { %1551 = vrot.lane.b32.xlu0 %v2363_v28, %s2443_s22 }
0x14d3   :  { %v1526_v29 = vpop.permute.xlu1 %1525 }
0x14d4   :  { %v1528_v30 = vmul.f32 %v2357_v8, %v1526_v29 }
0x14d6   :  { %v1555_v33 = vsel %vm76_vm9, %v1528_v30, %v2851_v55  ;;  %v2227_v55 = vpack.c.bf16 %v58_v54, %v57_v53 }
0x14d7   :  { %1635 = vrot.lane.b32.xlu0 %v1555_v33, %s2452_s1 }
0x14e2   :  { %v1552_v35 = vpop.permute.xlu0 %1551 }
0x14e3   :  { %v1554_v36 = vmul.f32 %v2359_v12, %v1552_v35 }
0x14e5   :  { %v1557_v37 = vsel %vm75_vm8, %v1554_v36, %v2858_v58 }
0x14e6   :  { %1560 = vrot.lane.b32.xlu1 %v1557_v37, %s2452_s1 }
0x1549   :  { %v1636_v38 = vpop.permute.xlu0 %1635 }
0x154a   :  { %2083 = vmatmul.mubr.msk.f32.vlgmr.msra.gmra.mrb[14].mxu1 %vm107_vm2, %v1636_v38 }
0x154b   :  { %2104 = vmatprep.mubr.msk.f32.mxu1 %vm2451_vm0, %v2450_v21  ;;  %2225 = vmatpush3.bf16.msra.mxu1 %v2224_v49 }
0x154c   :  { %2226 = vmatprep.subr.bf16.mxu1 %v2449_v17 }
0x154f   :  { %2228 = vmatpush3.bf16.msra.mxu1 %v2227_v55 }
0x1558   :  { %v1561_v39 = vpop.permute.xlu1 %1560 }
0x1559   :  { %2072 = vmatmul.mubr.msk.f32.vlgmr.msra.gmra.mrb[14].mxu0 %vm107_vm2, %v1561_v39 }
0x155a   :  { %2093 = vmatprep.mubr.msk.f32.mxu0 %vm2451_vm0, %v2450_v21 }
0x161d   :  { %v1705_v40 = vpop.f32.mrb[14].mxu1 }
0x161e   :  { %v2084_v41 = vpop.f32.mrb[15].mxu1 }
0x162c   :  { %v1630_v42 = vpop.f32.mrb[14].mxu0 }
0x162d   :  { %v1706_v43 = vadd.f32 %v1705_v40, %v1630_v42  ;;  %v2073_v45 = vpop.f32.mrb[15].mxu0 }
0x162f   :  { %v1709_v46 = vadd.f32 %v1706_v43, %v2554_v44  ;;  %v59_v44 = vld [vmem:[#allocation5 + $0xc0] sm:$0xff] }
0x1630   :  { %v2218_v58 = vpack.c.bf16 %v60_v56, %v59_v44 }
0x1631   :  { %2364 = vtanh.f32 %v1709_v46  ;;  %v1928_v51 = vmul.f32 -1.442695, %v1709_v46 }
0x1632   :  { %2219 = vmatpush3.bf16.msra.mxu0 %v2218_v58 }
0x1633   :  { %2366 = vpow2.f32 %v1928_v51  ;;  %2220 = vmatprep.subr.bf16.mxu0 %v2449_v17 }
0x1636   :  { %2222 = vmatpush3.bf16.msra.mxu0 %v2221_v60 }
0x163b   :  { %v2365_v50 = vpop.eup %2364 }
0x163c   :  { %1719 = vrot.lane.b32.xlu1 %v2365_v50, %s2443_s22 }
0x163d   :  { %v2367_v21 = vpop.eup %2366 }
0x163e   :  { %v1713_v52 = vadd.f32 1.0, %v2367_v21 }
0x1640   :  { %2368 = vrcp.f32 %v1713_v52 }
0x164a   :  { %v2369_v23 = vpop.eup %2368 }
0x164b   :  { %v1717_v0 = vmul.f32 %v2369_v23, %v1558_v63 }
0x16ae   :  { %v1720_v61 = vpop.permute.xlu1 %1719 }
0x16af   :  { %v1722_v62 = vmul.f32 %v2369_v23, %v1720_v61 }
0x16b1   :  { %1724 = vrot.lane.b32.xlu0 %v1722_v62, %s2443_s22 }
0x16b5   :  { %1805 = vrot.lane.b32.xlu0 %v1556_v32, %s2453_s2 }
0x1723   :  { %v1725_v1 = vpop.permute.xlu0 %1724 }
0x1724   :  { %v1727_v16 = vadd.f32 %v1725_v1, %v1717_v0 }
0x1726   :  { %v1728_v17 = vsel %vm76_vm9, %v1727_v16, %v1558_v63 }
0x1727   :  { %v1806_v2 = vpop.permute.xlu0 %1805  ;;  %1730 = vrot.lane.b32.xlu1 %v1728_v17, %s2453_s2 }
0x1728   :  { %2105 = vmatmul.mubr.msk.f32.vlgmr.msra.gmra.mrb[16].mxu1 %vm107_vm2, %v1806_v2 }
0x1799   :  { %v1731_v3 = vpop.permute.xlu1 %1730 }
0x179a   :  { %2094 = vmatmul.mubr.msk.f32.vlgmr.msra.gmra.mrb[16].mxu0 %vm107_vm2, %v1731_v3 }
0x17fb   :  { %v1875_v27 = vpop.f32.mrb[16].mxu1 }
0x17fc   :  { %v2106_v4 = vpop.f32.mrb[17].mxu1 }
0x186d   :  { %v1800_v6 = vpop.f32.mrb[16].mxu0 }
0x186e   :  { %v1876_v7 = vadd.f32 %v1875_v27, %v1800_v6  ;;  %v2095_v8 = vpop.f32.mrb[17].mxu0 }
0x1870   :  { %v1879_v9 = vadd.f32 %v1876_v7, %v64_v5 }
0x1872   :  { %1881 = vst.msk [vmem:[#allocation7] sm:$0x3] %vm1880_vm10, %v1879_v9 }
0x1873   :  { %2425 = shalt.err (!%p2422_p6)
}
0x1874   :  { %s2426_s19 = scalar_lea.hbm %s2942_s3, 32 }
0x1875   :  { %p2427_p7 = scmp.ne.s32.totalorder %s2942_s3, %s2426_s19  ;;  %p2430_p8 = scmp.lt.u32.totalorder %s2426_s19, %s2942_s3 }
0x1877   :  { %p2432_p9 = pnand %p2430_p8, %p2427_p7 }
0x1879   :  { %2435 = shalt.err (!%p2432_p9)
}
0x187a   :  { %1891 = dma.vmem_to_hbm [thread:$0]  %s1889_s15, 32, %s2942_s3, [#allocation4]  }
0x187b   :  { %2440 = dma.done.wait [#allocation4], 32  }
0x187c   :  { %2441 = vsyncadd [#allocation4], 4294967264 }
0x187d   :  { %1895 = vsyncpa [#allocation3], 1 }
0x187e   :  { %1896 = vsyncpa [#allocation6], 1 }
0x187f   :  { %1897 = vsyncpa [#allocation4], 1 }

</bundles_post_ra>
